<compile_context>
chip_gen: v5e
topology: v5e:2x2
jax: 0.10.0
libtpu: 0.0.40
codegen_flags: <defaults>
</compile_context>

<pallas_src>
import functools

import jax
import jax.numpy as jnp
from jax import lax
from jax.experimental import pallas as pl
from jax.experimental.pallas import tpu as pltpu

EPS = 1e-6
OUT_PAD = 128                      # lane-dense width for every MLP's final layer
MATMUL_DTYPE = jnp.bfloat16        # MXU operand dtype (accumulation stays f32)
VMEM_LIMIT = 32 * 1024 * 1024      # explicit scoped-VMEM limit


def _round_up(x, m):
    return (x + m - 1) // m * m


def _cdiv(a, b):
    return (a + b - 1) // b


# ----------------------------------------------------------------------------
# Pallas kernel 1: row-tiled fused MLP over a stack of weight sets
#   (Linear + ReLU)* -> Linear -> Sigmoid
# ----------------------------------------------------------------------------
def _mlp_kernel_factory(n_layers, two_inputs, matmul_dtype):
    n_x = 2 if two_inputs else 1

    def kernel(*refs):
        # refs = (x[, x2], w0, b0, ..., w_{L-1}, b_{L-1}, out)
        out_ref = refs[-1]
        if two_inputs:
            # weight-set 0 sees the skill embedding only; set 1 sees skill + multiplex.
            sel = (pl.program_id(0) == 1).astype(jnp.float32)
            h = refs[0][...] + refs[1][...] * sel          # (TM, D_in) f32
        else:
            h = refs[0][...]
        for i in range(n_layers):
            w = refs[n_x + 2 * i][0]                       # (d_in, d_out)
            b = refs[n_x + 2 * i + 1][0]                   # (1, d_out) f32
            h = jnp.dot(h.astype(matmul_dtype), w.astype(matmul_dtype),
                        preferred_element_type=jnp.float32) + b
            h = jnp.maximum(h, 0.0) if i < n_layers - 1 else jax.nn.sigmoid(h)
        out_ref[0] = h

    return kernel


def _mlp_pallas(xs, weights, biases, xm=None, tm_max=512):
    """Row-tiled fused MLP over a stack of S weight sets.

    xs:         (N, D_in) f32.  If xm is given, weight set 0 uses xs and set 1 uses xs+xm
                (sum formed in-kernel; both tiles are streamed anyway).
    weights[i]: (S, d_i, d_{i+1})   (last layer's d_out zero-padded to OUT_PAD)
    biases[i]:  (S, 1, d_{i+1})
    returns     (S, N, d_last) f32
    """
    N, D_in = xs.shape
    S = weights[0].shape[0]
    n_layers = len(weights)
    out_dim = weights[-1].shape[-1]
    two_inputs = xm is not None

    # Pick a row tile <= tm_max that minimizes padding waste.
    n_tiles = max(1, _cdiv(N, tm_max))
    tm = _round_up(_cdiv(N, n_tiles), 8)
    n_pad = n_tiles * tm
    if n_pad != N:
        xs = jnp.pad(xs, ((0, n_pad - N), (0, 0)))
        if two_inputs:
            xm = jnp.pad(xm, ((0, n_pad - N), (0, 0)))

    x_spec = pl.BlockSpec((tm, D_in), lambda si, ti: (ti, 0))
    in_specs = [x_spec] + ([x_spec] if two_inputs else [])
    args = [xs] + ([xm] if two_inputs else [])
    for w, b in zip(weights, biases):
        in_specs.append(pl.BlockSpec((1,) + w.shape[1:], lambda si, ti: (si, 0, 0)))
        in_specs.append(pl.BlockSpec((1,) + b.shape[1:], lambda si, ti: (si, 0, 0)))
        args.append(w)
        args.append(b)

    out = pl.pallas_call(
        _mlp_kernel_factory(n_layers, two_inputs, MATMUL_DTYPE),
        out_shape=jax.ShapeDtypeStruct((S, n_pad, out_dim), jnp.float32),
        # weight-set axis outer (weights re-DMA'd only when it changes), row tiles inner
        grid=(S, n_tiles),
        in_specs=in_specs,
        out_specs=pl.BlockSpec((1, tm, out_dim), lambda si, ti: (si, ti, 0)),
        compiler_params=pltpu.CompilerParams(
            dimension_semantics=("parallel", "parallel"),
            vmem_limit_bytes=VMEM_LIMIT),
    )(*args)
    return out[:, :N, :]


# ----------------------------------------------------------------------------
# Pallas kernel 2: sequential BKT recurrence
#   batch packed (sublane x lane), time tiled on an "arbitrary" grid axis
# ----------------------------------------------------------------------------
def _bkt_scan_kernel(l_ref, g_ref, s_ref, y_ref, lat0_ref,
                     corrects_ref, latents_ref, latent_sc):
    # Per grid step, data refs hold a (TT, 1, S_sub, 128) time x batch-block tile.
    @pl.when(pl.program_id(1) == 0)
    def _():                                   # new batch block -> (re)load the prior
        latent_sc[...] = lat0_ref[0]

    n_chunks = l_ref.shape[0] // 8             # TT is a multiple of 8

    def chunk(c, latent):                      # latent: (S_sub, 128) f32, carried
        t0 = pl.multiple_of(c * 8, 8)
        for r in range(8):                     # static unroll: LLO can co-issue across steps
            t = t0 + r
            # Param clamp (reference's torch.clamp) is fused here.
            l = jnp.clip(l_ref[t, 0], EPS, 1.0 - EPS)
            g = jnp.clip(g_ref[t, 0], EPS, 1.0 - EPS)
            s = jnp.clip(s_ref[t, 0], EPS, 1.0 - EPS)
            yc = y_ref[t, 0]
            latents_ref[t, 0] = latent
            one_m_lat = 1.0 - latent
            ls = latent * (1.0 - s)
            correct = ls + one_m_lat * g
            corrects_ref[t, 0] = correct
            # k_t1's denominator equals `correct` -> reuse; reciprocals use the idle EUP slot.
            k_t1 = ls * pl.reciprocal(correct, approx=True)
            num0 = latent * s
            k_t0 = num0 * pl.reciprocal(num0 + one_m_lat * (1.0 - g), approx=True)
            # y == -1 (reference maps it to 0) still fails "> 0.5" -> identical branch selection.
            k_t = jnp.where(yc > 0.5, k_t1, k_t0)
            latent = jnp.clip(k_t + (1.0 - k_t) * l, EPS, 1.0 - EPS)
        return latent

    latent_sc[...] = lax.fori_loop(0, n_chunks, chunk, latent_sc[...])


def bkt_scan_pallas(l_b, g_b, s_b, y_b, lat0, tt):
    """l/g/s/y: (T_pad, NB, S_sub, 128) f32; lat0: (NB, S_sub, 128) f32.
    Returns (corrects, latents) with the same (T_pad, NB, S_sub, 128) layout."""
    T_pad, NB, S_sub, L = l_b.shape
    nt = T_pad // tt
    data_spec = pl.BlockSpec((tt, 1, S_sub, L), lambda nb, tb: (tb, nb, 0, 0))
    lat0_spec = pl.BlockSpec((1, S_sub, L), lambda nb, tb: (nb, 0, 0))
    return pl.pallas_call(
        _bkt_scan_kernel,
        out_shape=(jax.ShapeDtypeStruct(l_b.shape, jnp.float32),
                   jax.ShapeDtypeStruct(l_b.shape, jnp.float32)),
        grid=(NB, nt),                         # batch blocks parallel (megacore), time carried
        in_specs=[data_spec, data_spec, data_spec, data_spec, lat0_spec],
        out_specs=(data_spec, data_spec),
        scratch_shapes=[pltpu.VMEM((S_sub, L), jnp.float32)],   # latent carry across time tiles
        compiler_params=pltpu.CompilerParams(
            dimension_semantics=("parallel", "arbitrary"),
            vmem_limit_bytes=VMEM_LIMIT),
    )(l_b, g_b, s_b, y_b, lat0)


# ----------------------------------------------------------------------------
# Parameter initialization (PyTorch-default-style), kernel-ready layout
# ----------------------------------------------------------------------------
def _linear_init(key, fan_in, fan_out):
    k1, k2 = jax.random.split(key)
    bound = 1.0 / (fan_in ** 0.5)
    w = jax.random.uniform(k1, (fan_in, fan_out), jnp.float32, -bound, bound)
    b = jax.random.uniform(k2, (fan_out,), jnp.float32, -bound, bound)
    return w, b


def _pad_out(w, b, out_pad):
    d_out = w.shape[-1]
    if d_out < out_pad:
        w = jnp.pad(w, ((0, 0), (0, out_pad - d_out)))
        b = jnp.pad(b, ((0, out_pad - d_out),))
    return w, b


def init_params(key, num_skills, num_multi, hidden_dim):
    """nn_skill_params / nn_multiplex_params (identical architecture) are stacked layer-wise
    along a leading weight-set axis of size 2 so one fused pallas_call evaluates both.  The
    last layer of every MLP is zero-padded to OUT_PAD=128 columns (lane-dense stores); the
    padded sigmoid(0)=0.5 columns are sliced away in glue."""
    H = hidden_dim
    keys = iter(jax.random.split(key, 32))

    def mlp(dims):
        return [_linear_init(next(keys), dims[i], dims[i + 1]) for i in range(len(dims) - 1)]

    skill = mlp([H, H, H, H, H, 3])      # nn_skill_params
    mplex = mlp([H, H, H, H, H, 3])      # nn_multiplex_params
    prior = mlp([H, H, H, H, 1])         # nn_prior

    sm_w, sm_b = [], []
    for li, ((ws, bs), (wm, bm)) in enumerate(zip(skill, mplex)):
        if li == len(skill) - 1:
            ws, bs = _pad_out(ws, bs, OUT_PAD)
            wm, bm = _pad_out(wm, bm, OUT_PAD)
        sm_w.append(jnp.stack([ws, wm], axis=0))           # (2, d_in, d_out)
        sm_b.append(jnp.stack([bs, bm], axis=0)[:, None])  # (2, 1, d_out)

    pr_w, pr_b = [], []
    for li, (w, b) in enumerate(prior):
        if li == len(prior) - 1:
            w, b = _pad_out(w, b, OUT_PAD)
        pr_w.append(w[None])                               # (1, d_in, d_out)
        pr_b.append(b[None, None, :])                      # (1, 1, d_out)

    skill_embed = jax.random.normal(next(keys), (num_skills, H), jnp.float32)
    multiplex_embed = jax.random.normal(next(keys), (num_multi, H), jnp.float32)
    return dict(sm_w=sm_w, sm_b=sm_b, prior_w=pr_w, prior_b=pr_b,
                skill_embed=skill_embed, multiplex_embed=multiplex_embed)


# ----------------------------------------------------------------------------
# Forward pass (glue in JAX, hot paths in Pallas)
# ----------------------------------------------------------------------------
@functools.partial(jax.jit, static_argnames=("variant",))
def bktnn_forward(p, X, y, variant="KT-IDEM"):
    """X: (B, T, 2) int32 [skill_id, multiplex_id]; y: (B, T) float32 in {-1, 0, 1}.
    Returns (corrects, latents), each (B, T) f32."""
    assert variant in ("KT-IDEM", "ILE")
    B, T = y.shape
    H = p["skill_embed"].shape[1]
    X = jnp.where(X == -1, 0, X)

    # Time-major gathers (only the int index matrices are transposed) so the downstream
    # scan layout needs no large f32 transposes.
    # TODO(synk): embedding gathers are data-dependent and stay in XLA.
    skill_emb = jnp.take(p["skill_embed"], X[..., 0].T, axis=0)       # (T, B, H)
    mplex_emb = jnp.take(p["multiplex_embed"], X[..., 1].T, axis=0)   # (T, B, H)

    N = T * B
    xs = skill_emb.reshape(N, H)
    xm = mplex_emb.reshape(N, H)

    # One fused, row-tiled pallas_call evaluates both 5-layer parameter MLPs.
    sm_out = _mlp_pallas(xs, p["sm_w"], p["sm_b"], xm=xm)             # (2, N, 128)
    skill_p = sm_out[0].reshape(T, B, OUT_PAD)
    mplex_p = sm_out[1].reshape(T, B, OUT_PAD)

    # Prior MLP on the first-timestep skill embedding (different depth -> separate tiny call).
    prior_out = _mlp_pallas(skill_emb[0], p["prior_w"], p["prior_b"])  # (1, B, 128)
    latent0 = prior_out[0, :, 0]          # (B,) sigmoid output, not clamped (matches reference)

    if variant == "KT-IDEM":
        l_tb, g_tb, s_tb = skill_p[..., 0], mplex_p[..., 1], mplex_p[..., 2]
    else:  # 'ILE'
        l_tb, g_tb, s_tb = mplex_p[..., 0], skill_p[..., 1], skill_p[..., 2]

    # Pack batch into (sublane, lane) = (S_sub, 128) blocks so every sequential BKT step
    # operates on up to a full (8,128) vreg; time is tiled along an "arbitrary" grid axis.
    # Padded lanes/steps carry safe 0.5 values and are sliced away afterwards.
    S_sub = min(8, _cdiv(B, 128))
    blk = S_sub * 128
    NB = _cdiv(B, blk)
    B_pad = NB * blk
    TT = min(128, _round_up(T, 8))        # time tile (multiple of 8 for the inner unroll)
    T_pad = _round_up(T, TT)

    def to_blocks(a_tb, pad_val):
        a = jnp.pad(a_tb.astype(jnp.float32),
                    ((0, T_pad - T), (0, B_pad - B)), constant_values=pad_val)
        return a.reshape(T_pad, NB, S_sub, 128)

    l_b, g_b, s_b = to_blocks(l_tb, 0.5), to_blocks(g_tb, 0.5), to_blocks(s_tb, 0.5)
    y_b = to_blocks(y.T, 0.0)
    lat0 = jnp.pad(latent0, (0, B_pad - B), constant_values=0.5).reshape(NB, S_sub, 128)

    corrects_b, latents_b = bkt_scan_pallas(l_b, g_b, s_b, y_b, lat0, TT)

    # TODO(synk): final (T,B)->(B,T) transposes and the 3-column param slices above remain
    # small XLA ops; fusing them would need in-kernel lane<->sublane transposes.
    corrects = corrects_b.reshape(T_pad, B_pad)[:T, :B].T
    latents = latents_b.reshape(T_pad, B_pad)[:T, :B].T
    return corrects, latents


if __name__ == "__main__":
    key = jax.random.PRNGKey(0)
    B, T, H = 2, 8, 32
    num_skills, num_multi = 16, 8

    kp, kx1, kx2, ky = jax.random.split(key, 4)
    params = init_params(kp, num_skills, num_multi, H)

    skill_ids = jax.random.randint(kx1, (B, T), 0, num_skills)
    mplex_ids = jax.random.randint(kx2, (B, T), 0, num_multi)
    X = jnp.stack([skill_ids, mplex_ids], axis=-1).astype(jnp.int32)
    y = jax.random.randint(ky, (B, T), -1, 2).astype(jnp.float32)   # values in {-1, 0, 1}

    corrects, latents = bktnn_forward(params, X, y, variant="KT-IDEM")
    jax.block_until_ready((corrects, latents))
    assert corrects.shape == (B, T) and latents.shape == (B, T)
    assert bool(jnp.all(jnp.isfinite(corrects))) and bool(jnp.all(jnp.isfinite(latents)))

    corrects2, latents2 = bktnn_forward(params, X, y, variant="ILE")
    jax.block_until_ready((corrects2, latents2))
    assert corrects2.shape == (B, T) and latents2.shape == (B, T)
    assert bool(jnp.all(jnp.isfinite(corrects2))) and bool(jnp.all(jnp.isfinite(latents2)))

    print("KERNEL_OK")
</pallas_src>

<mosaic_0001>
module attributes {stable_mosaic.version = 11 : i64} {
  func.func @kernel(%arg0: i32, %arg1: i32, %arg2: memref<8x32xf32, #tpu.memory_space<vmem>>, %arg3: memref<1x32x32xf32, #tpu.memory_space<vmem>>, %arg4: memref<1x1x32xf32, #tpu.memory_space<vmem>>, %arg5: memref<1x32x32xf32, #tpu.memory_space<vmem>>, %arg6: memref<1x1x32xf32, #tpu.memory_space<vmem>>, %arg7: memref<1x32x32xf32, #tpu.memory_space<vmem>>, %arg8: memref<1x1x32xf32, #tpu.memory_space<vmem>>, %arg9: memref<1x32x128xf32, #tpu.memory_space<vmem>>, %arg10: memref<1x1x128xf32, #tpu.memory_space<vmem>>, %arg11: memref<1x8x128xf32, #tpu.memory_space<vmem>>) attributes {dimension_semantics = [#tpu.dimension_semantics<parallel>, #tpu.dimension_semantics<parallel>], iteration_bounds = array<i64: 1, 1>, scalar_prefetch = 0 : i64, scratch_operands = 0 : i64, tpu.core_type = #tpu.core_type<tc>, window_params = [{transform_indices = @transform_0, window_bounds = array<i64: 8, 32>}, {transform_indices = @transform_1, window_bounds = array<i64: 1, 32, 32>}, {transform_indices = @transform_2, window_bounds = array<i64: 1, 1, 32>}, {transform_indices = @transform_3, window_bounds = array<i64: 1, 32, 32>}, {transform_indices = @transform_4, window_bounds = array<i64: 1, 1, 32>}, {transform_indices = @transform_5, window_bounds = array<i64: 1, 32, 32>}, {transform_indices = @transform_6, window_bounds = array<i64: 1, 1, 32>}, {transform_indices = @transform_7, window_bounds = array<i64: 1, 32, 128>}, {transform_indices = @transform_8, window_bounds = array<i64: 1, 1, 128>}, {transform_indices = @transform_9, window_bounds = array<i64: 1, 8, 128>}]} {
    %c0 = arith.constant 0 : index
    %c0_0 = arith.constant 0 : index
    %0 = vector.load %arg2[%c0, %c0_0] : memref<8x32xf32, #tpu.memory_space<vmem>>, vector<8x32xf32>
    %c0_1 = arith.constant 0 : index
    %c0_2 = arith.constant 0 : index
    %c0_3 = arith.constant 0 : index
    %1 = vector.load %arg3[%c0_1, %c0_2, %c0_3] : memref<1x32x32xf32, #tpu.memory_space<vmem>>, vector<1x32x32xf32>
    %2 = vector.shape_cast %1 : vector<1x32x32xf32> to vector<32x32xf32>
    %c0_4 = arith.constant 0 : index
    %c0_5 = arith.constant 0 : index
    %c0_6 = arith.constant 0 : index
    %3 = vector.load %arg4[%c0_4, %c0_5, %c0_6] : memref<1x1x32xf32, #tpu.memory_space<vmem>>, vector<1x1x32xf32>
    %4 = vector.shape_cast %3 : vector<1x1x32xf32> to vector<1x32xf32>
    %5 = arith.truncf %0 : vector<8x32xf32> to vector<8x32xbf16>
    %6 = arith.truncf %2 : vector<32x32xf32> to vector<32x32xbf16>
    %cst = arith.constant dense<0.000000e+00> : vector<8x32xf32>
    %7 = tpu.matmul %5, %6, %cst {dimension_numbers = #tpu.dot_dimension_numbers<[1], [0], [0], [1], [0, 0, 1, 1], [], []>} : vector<8x32xbf16>, vector<32x32xbf16>, vector<8x32xf32> -> vector<8x32xf32>
    %8 = vector.broadcast %4 : vector<1x32xf32> to vector<8x32xf32>
    %9 = arith.addf %7, %8 : vector<8x32xf32>
    %cst_7 = arith.constant 0.000000e+00 : f32
    %10 = vector.broadcast %cst_7 : f32 to vector<8x32xf32>
    %11 = arith.maximumf %9, %10 : vector<8x32xf32>
    %c0_8 = arith.constant 0 : index
    %c0_9 = arith.constant 0 : index
    %c0_10 = arith.constant 0 : index
    %12 = vector.load %arg5[%c0_8, %c0_9, %c0_10] : memref<1x32x32xf32, #tpu.memory_space<vmem>>, vector<1x32x32xf32>
    %13 = vector.shape_cast %12 : vector<1x32x32xf32> to vector<32x32xf32>
    %c0_11 = arith.constant 0 : index
    %c0_12 = arith.constant 0 : index
    %c0_13 = arith.constant 0 : index
    %14 = vector.load %arg6[%c0_11, %c0_12, %c0_13] : memref<1x1x32xf32, #tpu.memory_space<vmem>>, vector<1x1x32xf32>
    %15 = vector.shape_cast %14 : vector<1x1x32xf32> to vector<1x32xf32>
    %16 = arith.truncf %11 : vector<8x32xf32> to vector<8x32xbf16>
    %17 = arith.truncf %13 : vector<32x32xf32> to vector<32x32xbf16>
    %cst_14 = arith.constant dense<0.000000e+00> : vector<8x32xf32>
    %18 = tpu.matmul %16, %17, %cst_14 {dimension_numbers = #tpu.dot_dimension_numbers<[1], [0], [0], [1], [0, 0, 1, 1], [], []>} : vector<8x32xbf16>, vector<32x32xbf16>, vector<8x32xf32> -> vector<8x32xf32>
    %19 = vector.broadcast %15 : vector<1x32xf32> to vector<8x32xf32>
    %20 = arith.addf %18, %19 : vector<8x32xf32>
    %cst_15 = arith.constant 0.000000e+00 : f32
    %21 = vector.broadcast %cst_15 : f32 to vector<8x32xf32>
    %22 = arith.maximumf %20, %21 : vector<8x32xf32>
    %c0_16 = arith.constant 0 : index
    %c0_17 = arith.constant 0 : index
    %c0_18 = arith.constant 0 : index
    %23 = vector.load %arg7[%c0_16, %c0_17, %c0_18] : memref<1x32x32xf32, #tpu.memory_space<vmem>>, vector<1x32x32xf32>
    %24 = vector.shape_cast %23 : vector<1x32x32xf32> to vector<32x32xf32>
    %c0_19 = arith.constant 0 : index
    %c0_20 = arith.constant 0 : index
    %c0_21 = arith.constant 0 : index
    %25 = vector.load %arg8[%c0_19, %c0_20, %c0_21] : memref<1x1x32xf32, #tpu.memory_space<vmem>>, vector<1x1x32xf32>
    %26 = vector.shape_cast %25 : vector<1x1x32xf32> to vector<1x32xf32>
    %27 = arith.truncf %22 : vector<8x32xf32> to vector<8x32xbf16>
    %28 = arith.truncf %24 : vector<32x32xf32> to vector<32x32xbf16>
    %cst_22 = arith.constant dense<0.000000e+00> : vector<8x32xf32>
    %29 = tpu.matmul %27, %28, %cst_22 {dimension_numbers = #tpu.dot_dimension_numbers<[1], [0], [0], [1], [0, 0, 1, 1], [], []>} : vector<8x32xbf16>, vector<32x32xbf16>, vector<8x32xf32> -> vector<8x32xf32>
    %30 = vector.broadcast %26 : vector<1x32xf32> to vector<8x32xf32>
    %31 = arith.addf %29, %30 : vector<8x32xf32>
    %cst_23 = arith.constant 0.000000e+00 : f32
    %32 = vector.broadcast %cst_23 : f32 to vector<8x32xf32>
    %33 = arith.maximumf %31, %32 : vector<8x32xf32>
    %c0_24 = arith.constant 0 : index
    %c0_25 = arith.constant 0 : index
    %c0_26 = arith.constant 0 : index
    %34 = vector.load %arg9[%c0_24, %c0_25, %c0_26] : memref<1x32x128xf32, #tpu.memory_space<vmem>>, vector<1x32x128xf32>
    %35 = vector.shape_cast %34 : vector<1x32x128xf32> to vector<32x128xf32>
    %c0_27 = arith.constant 0 : index
    %c0_28 = arith.constant 0 : index
    %c0_29 = arith.constant 0 : index
    %36 = vector.load %arg10[%c0_27, %c0_28, %c0_29] : memref<1x1x128xf32, #tpu.memory_space<vmem>>, vector<1x1x128xf32>
    %37 = vector.shape_cast %36 : vector<1x1x128xf32> to vector<1x128xf32>
    %38 = arith.truncf %33 : vector<8x32xf32> to vector<8x32xbf16>
    %39 = arith.truncf %35 : vector<32x128xf32> to vector<32x128xbf16>
    %cst_30 = arith.constant dense<0.000000e+00> : vector<8x128xf32>
    %40 = tpu.matmul %38, %39, %cst_30 {dimension_numbers = #tpu.dot_dimension_numbers<[1], [0], [0], [1], [0, 0, 1, 1], [], []>} : vector<8x32xbf16>, vector<32x128xbf16>, vector<8x128xf32> -> vector<8x128xf32>
    %41 = vector.broadcast %37 : vector<1x128xf32> to vector<8x128xf32>
    %42 = arith.addf %40, %41 : vector<8x128xf32>
    %43 = arith.negf %42 : vector<8x128xf32>
    %44 = math.exp %43 : vector<8x128xf32>
    %cst_31 = arith.constant 1.000000e+00 : f32
    %45 = vector.broadcast %cst_31 : f32 to vector<8x128xf32>
    %46 = arith.addf %45, %44 : vector<8x128xf32>
    %47 = arith.divf %45, %46 : vector<8x128xf32>
    %c0_32 = arith.constant 0 : index
    %c0_33 = arith.constant 0 : index
    %c0_34 = arith.constant 0 : index
    %48 = vector.load %arg11[%c0_32, %c0_33, %c0_34] : memref<1x8x128xf32, #tpu.memory_space<vmem>>, vector<1x8x128xf32>
    %49 = vector.shape_cast %48 : vector<1x8x128xf32> to vector<8x128xf32>
    %50 = vector.shape_cast %47 : vector<8x128xf32> to vector<1x8x128xf32>
    tpu.vector_store %arg11[%c0_32, %c0_33, %c0_34], %50 {strides = array<i32>} : memref<1x8x128xf32, #tpu.memory_space<vmem>>, vector<1x8x128xf32>,
    return
  }
  func.func @transform_0(%arg0: i32, %arg1: i32) -> (i32, i32) {
    %c0_i32 = arith.constant 0 : i32
    %c0_i32_0 = arith.constant 0 : i32
    return %arg1, %c0_i32 : i32, i32
  }
  func.func @transform_1(%arg0: i32, %arg1: i32) -> (i32, i32, i32) {
    %c0_i32 = arith.constant 0 : i32
    %c0_i32_0 = arith.constant 0 : i32
    %c0_i32_1 = arith.constant 0 : i32
    return %arg0, %c0_i32, %c0_i32_0 : i32, i32, i32
  }
  func.func @transform_2(%arg0: i32, %arg1: i32) -> (i32, i32, i32) {
    %c0_i32 = arith.constant 0 : i32
    %c0_i32_0 = arith.constant 0 : i32
    %c0_i32_1 = arith.constant 0 : i32
    return %arg0, %c0_i32, %c0_i32_0 : i32, i32, i32
  }
  func.func @transform_3(%arg0: i32, %arg1: i32) -> (i32, i32, i32) {
    %c0_i32 = arith.constant 0 : i32
    %c0_i32_0 = arith.constant 0 : i32
    %c0_i32_1 = arith.constant 0 : i32
    return %arg0, %c0_i32, %c0_i32_0 : i32, i32, i32
  }
  func.func @transform_4(%arg0: i32, %arg1: i32) -> (i32, i32, i32) {
    %c0_i32 = arith.constant 0 : i32
    %c0_i32_0 = arith.constant 0 : i32
    %c0_i32_1 = arith.constant 0 : i32
    return %arg0, %c0_i32, %c0_i32_0 : i32, i32, i32
  }
  func.func @transform_5(%arg0: i32, %arg1: i32) -> (i32, i32, i32) {
    %c0_i32 = arith.constant 0 : i32
    %c0_i32_0 = arith.constant 0 : i32
    %c0_i32_1 = arith.constant 0 : i32
    return %arg0, %c0_i32, %c0_i32_0 : i32, i32, i32
  }
  func.func @transform_6(%arg0: i32, %arg1: i32) -> (i32, i32, i32) {
    %c0_i32 = arith.constant 0 : i32
    %c0_i32_0 = arith.constant 0 : i32
    %c0_i32_1 = arith.constant 0 : i32
    return %arg0, %c0_i32, %c0_i32_0 : i32, i32, i32
  }
  func.func @transform_7(%arg0: i32, %arg1: i32) -> (i32, i32, i32) {
    %c0_i32 = arith.constant 0 : i32
    %c0_i32_0 = arith.constant 0 : i32
    %c0_i32_1 = arith.constant 0 : i32
    return %arg0, %c0_i32, %c0_i32_0 : i32, i32, i32
  }
  func.func @transform_8(%arg0: i32, %arg1: i32) -> (i32, i32, i32) {
    %c0_i32 = arith.constant 0 : i32
    %c0_i32_0 = arith.constant 0 : i32
    %c0_i32_1 = arith.constant 0 : i32
    return %arg0, %c0_i32, %c0_i32_0 : i32, i32, i32
  }
  func.func @transform_9(%arg0: i32, %arg1: i32) -> (i32, i32, i32) {
    %c0_i32 = arith.constant 0 : i32
    %c0_i32_0 = arith.constant 0 : i32
    return %arg0, %arg1, %c0_i32 : i32, i32, i32
  }
}

module attributes {stable_mosaic.version = 11 : i64} {
  func.func @kernel(%arg0: i32, %arg1: i32, %arg2: memref<16x32xf32, #tpu.memory_space<vmem>>, %arg3: memref<16x32xf32, #tpu.memory_space<vmem>>, %arg4: memref<1x32x32xf32, #tpu.memory_space<vmem>>, %arg5: memref<1x1x32xf32, #tpu.memory_space<vmem>>, %arg6: memref<1x32x32xf32, #tpu.memory_space<vmem>>, %arg7: memref<1x1x32xf32, #tpu.memory_space<vmem>>, %arg8: memref<1x32x32xf32, #tpu.memory_space<vmem>>, %arg9: memref<1x1x32xf32, #tpu.memory_space<vmem>>, %arg10: memref<1x32x32xf32, #tpu.memory_space<vmem>>, %arg11: memref<1x1x32xf32, #tpu.memory_space<vmem>>, %arg12: memref<1x32x128xf32, #tpu.memory_space<vmem>>, %arg13: memref<1x1x128xf32, #tpu.memory_space<vmem>>, %arg14: memref<1x16x128xf32, #tpu.memory_space<vmem>>) attributes {dimension_semantics = [#tpu.dimension_semantics<parallel>, #tpu.dimension_semantics<parallel>], iteration_bounds = array<i64: 2, 1>, scalar_prefetch = 0 : i64, scratch_operands = 0 : i64, tpu.core_type = #tpu.core_type<tc>, window_params = [{transform_indices = @transform_0, window_bounds = array<i64: 16, 32>}, {transform_indices = @transform_1, window_bounds = array<i64: 16, 32>}, {transform_indices = @transform_2, window_bounds = array<i64: 1, 32, 32>}, {transform_indices = @transform_3, window_bounds = array<i64: 1, 1, 32>}, {transform_indices = @transform_4, window_bounds = array<i64: 1, 32, 32>}, {transform_indices = @transform_5, window_bounds = array<i64: 1, 1, 32>}, {transform_indices = @transform_6, window_bounds = array<i64: 1, 32, 32>}, {transform_indices = @transform_7, window_bounds = array<i64: 1, 1, 32>}, {transform_indices = @transform_8, window_bounds = array<i64: 1, 32, 32>}, {transform_indices = @transform_9, window_bounds = array<i64: 1, 1, 32>}, {transform_indices = @transform_10, window_bounds = array<i64: 1, 32, 128>}, {transform_indices = @transform_11, window_bounds = array<i64: 1, 1, 128>}, {transform_indices = @transform_12, window_bounds = array<i64: 1, 16, 128>}]} {
    %c1_i32 = arith.constant 1 : i32
    %0 = arith.cmpi eq, %arg0, %c1_i32 : i32
    %1 = arith.extui %0 : i1 to i32
    %2 = arith.sitofp %1 : i32 to f32
    %c0 = arith.constant 0 : index
    %c0_0 = arith.constant 0 : index
    %3 = vector.load %arg2[%c0, %c0_0] : memref<16x32xf32, #tpu.memory_space<vmem>>, vector<16x32xf32>
    %c0_1 = arith.constant 0 : index
    %c0_2 = arith.constant 0 : index
    %4 = vector.load %arg3[%c0_1, %c0_2] : memref<16x32xf32, #tpu.memory_space<vmem>>, vector<16x32xf32>
    %5 = vector.broadcast %2 : f32 to vector<16x32xf32>
    %6 = arith.mulf %4, %5 : vector<16x32xf32>
    %7 = arith.addf %3, %6 : vector<16x32xf32>
    %c0_3 = arith.constant 0 : index
    %c0_4 = arith.constant 0 : index
    %c0_5 = arith.constant 0 : index
    %8 = vector.load %arg4[%c0_3, %c0_4, %c0_5] : memref<1x32x32xf32, #tpu.memory_space<vmem>>, vector<1x32x32xf32>
    %9 = vector.shape_cast %8 : vector<1x32x32xf32> to vector<32x32xf32>
    %c0_6 = arith.constant 0 : index
    %c0_7 = arith.constant 0 : index
    %c0_8 = arith.constant 0 : index
    %10 = vector.load %arg5[%c0_6, %c0_7, %c0_8] : memref<1x1x32xf32, #tpu.memory_space<vmem>>, vector<1x1x32xf32>
    %11 = vector.shape_cast %10 : vector<1x1x32xf32> to vector<1x32xf32>
    %12 = arith.truncf %7 : vector<16x32xf32> to vector<16x32xbf16>
    %13 = arith.truncf %9 : vector<32x32xf32> to vector<32x32xbf16>
    %cst = arith.constant dense<0.000000e+00> : vector<16x32xf32>
    %14 = tpu.matmul %12, %13, %cst {dimension_numbers = #tpu.dot_dimension_numbers<[1], [0], [0], [1], [0, 0, 1, 1], [], []>} : vector<16x32xbf16>, vector<32x32xbf16>, vector<16x32xf32> -> vector<16x32xf32>
    %15 = vector.broadcast %11 : vector<1x32xf32> to vector<16x32xf32>
    %16 = arith.addf %14, %15 : vector<16x32xf32>
    %cst_9 = arith.constant 0.000000e+00 : f32
    %17 = vector.broadcast %cst_9 : f32 to vector<16x32xf32>
    %18 = arith.maximumf %16, %17 : vector<16x32xf32>
    %c0_10 = arith.constant 0 : index
    %c0_11 = arith.constant 0 : index
    %c0_12 = arith.constant 0 : index
    %19 = vector.load %arg6[%c0_10, %c0_11, %c0_12] : memref<1x32x32xf32, #tpu.memory_space<vmem>>, vector<1x32x32xf32>
    %20 = vector.shape_cast %19 : vector<1x32x32xf32> to vector<32x32xf32>
    %c0_13 = arith.constant 0 : index
    %c0_14 = arith.constant 0 : index
    %c0_15 = arith.constant 0 : index
    %21 = vector.load %arg7[%c0_13, %c0_14, %c0_15] : memref<1x1x32xf32, #tpu.memory_space<vmem>>, vector<1x1x32xf32>
    %22 = vector.shape_cast %21 : vector<1x1x32xf32> to vector<1x32xf32>
    %23 = arith.truncf %18 : vector<16x32xf32> to vector<16x32xbf16>
    %24 = arith.truncf %20 : vector<32x32xf32> to vector<32x32xbf16>
    %cst_16 = arith.constant dense<0.000000e+00> : vector<16x32xf32>
    %25 = tpu.matmul %23, %24, %cst_16 {dimension_numbers = #tpu.dot_dimension_numbers<[1], [0], [0], [1], [0, 0, 1, 1], [], []>} : vector<16x32xbf16>, vector<32x32xbf16>, vector<16x32xf32> -> vector<16x32xf32>
    %26 = vector.broadcast %22 : vector<1x32xf32> to vector<16x32xf32>
    %27 = arith.addf %25, %26 : vector<16x32xf32>
    %cst_17 = arith.constant 0.000000e+00 : f32
    %28 = vector.broadcast %cst_17 : f32 to vector<16x32xf32>
    %29 = arith.maximumf %27, %28 : vector<16x32xf32>
    %c0_18 = arith.constant 0 : index
    %c0_19 = arith.constant 0 : index
    %c0_20 = arith.constant 0 : index
    %30 = vector.load %arg8[%c0_18, %c0_19, %c0_20] : memref<1x32x32xf32, #tpu.memory_space<vmem>>, vector<1x32x32xf32>
    %31 = vector.shape_cast %30 : vector<1x32x32xf32> to vector<32x32xf32>
    %c0_21 = arith.constant 0 : index
    %c0_22 = arith.constant 0 : index
    %c0_23 = arith.constant 0 : index
    %32 = vector.load %arg9[%c0_21, %c0_22, %c0_23] : memref<1x1x32xf32, #tpu.memory_space<vmem>>, vector<1x1x32xf32>
    %33 = vector.shape_cast %32 : vector<1x1x32xf32> to vector<1x32xf32>
    %34 = arith.truncf %29 : vector<16x32xf32> to vector<16x32xbf16>
    %35 = arith.truncf %31 : vector<32x32xf32> to vector<32x32xbf16>
    %cst_24 = arith.constant dense<0.000000e+00> : vector<16x32xf32>
    %36 = tpu.matmul %34, %35, %cst_24 {dimension_numbers = #tpu.dot_dimension_numbers<[1], [0], [0], [1], [0, 0, 1, 1], [], []>} : vector<16x32xbf16>, vector<32x32xbf16>, vector<16x32xf32> -> vector<16x32xf32>
    %37 = vector.broadcast %33 : vector<1x32xf32> to vector<16x32xf32>
    %38 = arith.addf %36, %37 : vector<16x32xf32>
    %cst_25 = arith.constant 0.000000e+00 : f32
    %39 = vector.broadcast %cst_25 : f32 to vector<16x32xf32>
    %40 = arith.maximumf %38, %39 : vector<16x32xf32>
    %c0_26 = arith.constant 0 : index
    %c0_27 = arith.constant 0 : index
    %c0_28 = arith.constant 0 : index
    %41 = vector.load %arg10[%c0_26, %c0_27, %c0_28] : memref<1x32x32xf32, #tpu.memory_space<vmem>>, vector<1x32x32xf32>
    %42 = vector.shape_cast %41 : vector<1x32x32xf32> to vector<32x32xf32>
    %c0_29 = arith.constant 0 : index
    %c0_30 = arith.constant 0 : index
    %c0_31 = arith.constant 0 : index
    %43 = vector.load %arg11[%c0_29, %c0_30, %c0_31] : memref<1x1x32xf32, #tpu.memory_space<vmem>>, vector<1x1x32xf32>
    %44 = vector.shape_cast %43 : vector<1x1x32xf32> to vector<1x32xf32>
    %45 = arith.truncf %40 : vector<16x32xf32> to vector<16x32xbf16>
    %46 = arith.truncf %42 : vector<32x32xf32> to vector<32x32xbf16>
    %cst_32 = arith.constant dense<0.000000e+00> : vector<16x32xf32>
    %47 = tpu.matmul %45, %46, %cst_32 {dimension_numbers = #tpu.dot_dimension_numbers<[1], [0], [0], [1], [0, 0, 1, 1], [], []>} : vector<16x32xbf16>, vector<32x32xbf16>, vector<16x32xf32> -> vector<16x32xf32>
    %48 = vector.broadcast %44 : vector<1x32xf32> to vector<16x32xf32>
    %49 = arith.addf %47, %48 : vector<16x32xf32>
    %cst_33 = arith.constant 0.000000e+00 : f32
    %50 = vector.broadcast %cst_33 : f32 to vector<16x32xf32>
    %51 = arith.maximumf %49, %50 : vector<16x32xf32>
    %c0_34 = arith.constant 0 : index
    %c0_35 = arith.constant 0 : index
    %c0_36 = arith.constant 0 : index
    %52 = vector.load %arg12[%c0_34, %c0_35, %c0_36] : memref<1x32x128xf32, #tpu.memory_space<vmem>>, vector<1x32x128xf32>
    %53 = vector.shape_cast %52 : vector<1x32x128xf32> to vector<32x128xf32>
    %c0_37 = arith.constant 0 : index
    %c0_38 = arith.constant 0 : index
    %c0_39 = arith.constant 0 : index
    %54 = vector.load %arg13[%c0_37, %c0_38, %c0_39] : memref<1x1x128xf32, #tpu.memory_space<vmem>>, vector<1x1x128xf32>
    %55 = vector.shape_cast %54 : vector<1x1x128xf32> to vector<1x128xf32>
    %56 = arith.truncf %51 : vector<16x32xf32> to vector<16x32xbf16>
    %57 = arith.truncf %53 : vector<32x128xf32> to vector<32x128xbf16>
    %cst_40 = arith.constant dense<0.000000e+00> : vector<16x128xf32>
    %58 = tpu.matmul %56, %57, %cst_40 {dimension_numbers = #tpu.dot_dimension_numbers<[1], [0], [0], [1], [0, 0, 1, 1], [], []>} : vector<16x32xbf16>, vector<32x128xbf16>, vector<16x128xf32> -> vector<16x128xf32>
    %59 = vector.broadcast %55 : vector<1x128xf32> to vector<16x128xf32>
    %60 = arith.addf %58, %59 : vector<16x128xf32>
    %61 = arith.negf %60 : vector<16x128xf32>
    %62 = math.exp %61 : vector<16x128xf32>
    %cst_41 = arith.constant 1.000000e+00 : f32
    %63 = vector.broadcast %cst_41 : f32 to vector<16x128xf32>
    %64 = arith.addf %63, %62 : vector<16x128xf32>
    %65 = arith.divf %63, %64 : vector<16x128xf32>
    %c0_42 = arith.constant 0 : index
    %c0_43 = arith.constant 0 : index
    %c0_44 = arith.constant 0 : index
    %66 = vector.load %arg14[%c0_42, %c0_43, %c0_44] : memref<1x16x128xf32, #tpu.memory_space<vmem>>, vector<1x16x128xf32>
    %67 = vector.shape_cast %66 : vector<1x16x128xf32> to vector<16x128xf32>
    %68 = vector.shape_cast %65 : vector<16x128xf32> to vector<1x16x128xf32>
    tpu.vector_store %arg14[%c0_42, %c0_43, %c0_44], %68 {strides = array<i32>} : memref<1x16x128xf32, #tpu.memory_space<vmem>>, vector<1x16x128xf32>,
    return
  }
  func.func @transform_0(%arg0: i32, %arg1: i32) -> (i32, i32) {
    %c0_i32 = arith.constant 0 : i32
    %c0_i32_0 = arith.constant 0 : i32
    return %arg1, %c0_i32 : i32, i32
  }
  func.func @transform_1(%arg0: i32, %arg1: i32) -> (i32, i32) {
    %c0_i32 = arith.constant 0 : i32
    %c0_i32_0 = arith.constant 0 : i32
    return %arg1, %c0_i32 : i32, i32
  }
  func.func @transform_2(%arg0: i32, %arg1: i32) -> (i32, i32, i32) {
    %c0_i32 = arith.constant 0 : i32
    %c0_i32_0 = arith.constant 0 : i32
    %c0_i32_1 = arith.constant 0 : i32
    return %arg0, %c0_i32, %c0_i32_0 : i32, i32, i32
  }
  func.func @transform_3(%arg0: i32, %arg1: i32) -> (i32, i32, i32) {
    %c0_i32 = arith.constant 0 : i32
    %c0_i32_0 = arith.constant 0 : i32
    %c0_i32_1 = arith.constant 0 : i32
    return %arg0, %c0_i32, %c0_i32_0 : i32, i32, i32
  }
  func.func @transform_4(%arg0: i32, %arg1: i32) -> (i32, i32, i32) {
    %c0_i32 = arith.constant 0 : i32
    %c0_i32_0 = arith.constant 0 : i32
    %c0_i32_1 = arith.constant 0 : i32
    return %arg0, %c0_i32, %c0_i32_0 : i32, i32, i32
  }
  func.func @transform_5(%arg0: i32, %arg1: i32) -> (i32, i32, i32) {
    %c0_i32 = arith.constant 0 : i32
    %c0_i32_0 = arith.constant 0 : i32
    %c0_i32_1 = arith.constant 0 : i32
    return %arg0, %c0_i32, %c0_i32_0 : i32, i32, i32
  }
  func.func @transform_6(%arg0: i32, %arg1: i32) -> (i32, i32, i32) {
    %c0_i32 = arith.constant 0 : i32
    %c0_i32_0 = arith.constant 0 : i32
    %c0_i32_1 = arith.constant 0 : i32
    return %arg0, %c0_i32, %c0_i32_0 : i32, i32, i32
  }
  func.func @transform_7(%arg0: i32, %arg1: i32) -> (i32, i32, i32) {
    %c0_i32 = arith.constant 0 : i32
    %c0_i32_0 = arith.constant 0 : i32
    %c0_i32_1 = arith.constant 0 : i32
    return %arg0, %c0_i32, %c0_i32_0 : i32, i32, i32
  }
  func.func @transform_8(%arg0: i32, %arg1: i32) -> (i32, i32, i32) {
    %c0_i32 = arith.constant 0 : i32
    %c0_i32_0 = arith.constant 0 : i32
    %c0_i32_1 = arith.constant 0 : i32
    return %arg0, %c0_i32, %c0_i32_0 : i32, i32, i32
  }
  func.func @transform_9(%arg0: i32, %arg1: i32) -> (i32, i32, i32) {
    %c0_i32 = arith.constant 0 : i32
    %c0_i32_0 = arith.constant 0 : i32
    %c0_i32_1 = arith.constant 0 : i32
    return %arg0, %c0_i32, %c0_i32_0 : i32, i32, i32
  }
  func.func @transform_10(%arg0: i32, %arg1: i32) -> (i32, i32, i32) {
    %c0_i32 = arith.constant 0 : i32
    %c0_i32_0 = arith.constant 0 : i32
    %c0_i32_1 = arith.constant 0 : i32
    return %arg0, %c0_i32, %c0_i32_0 : i32, i32, i32
  }
  func.func @transform_11(%arg0: i32, %arg1: i32) -> (i32, i32, i32) {
    %c0_i32 = arith.constant 0 : i32
    %c0_i32_0 = arith.constant 0 : i32
    %c0_i32_1 = arith.constant 0 : i32
    return %arg0, %c0_i32, %c0_i32_0 : i32, i32, i32
  }
  func.func @transform_12(%arg0: i32, %arg1: i32) -> (i32, i32, i32) {
    %c0_i32 = arith.constant 0 : i32
    %c0_i32_0 = arith.constant 0 : i32
    return %arg0, %arg1, %c0_i32 : i32, i32, i32
  }
}

module attributes {stable_mosaic.version = 11 : i64} {
  func.func @_bkt_scan_kernel(%arg0: i32, %arg1: i32, %arg2: memref<8x1x1x128xf32, #tpu.memory_space<vmem>>, %arg3: memref<8x1x1x128xf32, #tpu.memory_space<vmem>>, %arg4: memref<8x1x1x128xf32, #tpu.memory_space<vmem>>, %arg5: memref<8x1x1x128xf32, #tpu.memory_space<vmem>>, %arg6: memref<1x1x128xf32, #tpu.memory_space<vmem>>, %arg7: memref<8x1x1x128xf32, #tpu.memory_space<vmem>>, %arg8: memref<8x1x1x128xf32, #tpu.memory_space<vmem>>, %arg9: memref<1x128xf32, #tpu.memory_space<vmem>>) attributes {dimension_semantics = [#tpu.dimension_semantics<parallel>, #tpu.dimension_semantics<arbitrary>], iteration_bounds = array<i64: 1, 1>, scalar_prefetch = 0 : i64, scratch_operands = 1 : i64, tpu.core_type = #tpu.core_type<tc>, window_params = [{transform_indices = @transform_0, window_bounds = array<i64: 8, 1, 1, 128>}, {transform_indices = @transform_1, window_bounds = array<i64: 8, 1, 1, 128>}, {transform_indices = @transform_2, window_bounds = array<i64: 8, 1, 1, 128>}, {transform_indices = @transform_3, window_bounds = array<i64: 8, 1, 1, 128>}, {transform_indices = @transform_4, window_bounds = array<i64: 1, 1, 128>}, {transform_indices = @transform_5, window_bounds = array<i64: 8, 1, 1, 128>}, {transform_indices = @transform_6, window_bounds = array<i64: 8, 1, 1, 128>}]} {
    %c0_i32 = arith.constant 0 : i32
    %0 = arith.cmpi eq, %arg1, %c0_i32 : i32
    %1 = arith.extui %0 : i1 to i32
    %c0_i32_0 = arith.constant 0 : i32
    %2 = arith.cmpi ne, %1, %c0_i32_0 : i32
    scf.if %2 {
      %c0_254 = arith.constant 0 : index
      %c0_255 = arith.constant 0 : index
      %c0_256 = arith.constant 0 : index
      %487 = vector.load %arg6[%c0_254, %c0_255, %c0_256] : memref<1x1x128xf32, #tpu.memory_space<vmem>>, vector<1x1x128xf32>
      %488 = vector.shape_cast %487 : vector<1x1x128xf32> to vector<1x128xf32>
      %c0_257 = arith.constant 0 : index
      %c0_258 = arith.constant 0 : index
      %489 = vector.load %arg9[%c0_257, %c0_258] : memref<1x128xf32, #tpu.memory_space<vmem>>, vector<1x128xf32>
      tpu.vector_store %arg9[%c0_257, %c0_258], %488 {strides = array<i32>} : memref<1x128xf32, #tpu.memory_space<vmem>>, vector<1x128xf32>,
    } else {
    }
    %c0 = arith.constant 0 : index
    %c0_1 = arith.constant 0 : index
    %3 = vector.load %arg9[%c0, %c0_1] : memref<1x128xf32, #tpu.memory_space<vmem>>, vector<1x128xf32>
    %c0_i32_2 = arith.constant 0 : i32
    %c8_i32 = arith.constant 8 : i32
    %4 = arith.muli %c0_i32_2, %c8_i32 : i32
    %5 = tpu.assume_multiple %4, 8 : i32
    %c0_i32_3 = arith.constant 0 : i32
    %6 = arith.addi %5, %c0_i32_3 : i32
    %7 = arith.index_cast %6 : i32 to index
    %c0_4 = arith.constant 0 : index
    %c0_5 = arith.constant 0 : index
    %c0_6 = arith.constant 0 : index
    %8 = vector.load %arg2[%7, %c0_4, %c0_5, %c0_6] : memref<8x1x1x128xf32, #tpu.memory_space<vmem>>, vector<1x1x1x128xf32>
    %9 = vector.shape_cast %8 : vector<1x1x1x128xf32> to vector<1x128xf32>
    %cst = arith.constant 9.99999997E-7 : f32
    %cst_7 = arith.constant 0.999998986 : f32
    %10 = vector.broadcast %cst : f32 to vector<1x128xf32>
    %11 = arith.maximumf %10, %9 : vector<1x128xf32>
    %12 = vector.broadcast %cst_7 : f32 to vector<1x128xf32>
    %13 = arith.minimumf %12, %11 : vector<1x128xf32>
    %14 = arith.index_cast %6 : i32 to index
    %c0_8 = arith.constant 0 : index
    %c0_9 = arith.constant 0 : index
    %c0_10 = arith.constant 0 : index
    %15 = vector.load %arg3[%14, %c0_8, %c0_9, %c0_10] : memref<8x1x1x128xf32, #tpu.memory_space<vmem>>, vector<1x1x1x128xf32>
    %16 = vector.shape_cast %15 : vector<1x1x1x128xf32> to vector<1x128xf32>
    %cst_11 = arith.constant 9.99999997E-7 : f32
    %cst_12 = arith.constant 0.999998986 : f32
    %17 = vector.broadcast %cst_11 : f32 to vector<1x128xf32>
    %18 = arith.maximumf %17, %16 : vector<1x128xf32>
    %19 = vector.broadcast %cst_12 : f32 to vector<1x128xf32>
    %20 = arith.minimumf %19, %18 : vector<1x128xf32>
    %21 = arith.index_cast %6 : i32 to index
    %c0_13 = arith.constant 0 : index
    %c0_14 = arith.constant 0 : index
    %c0_15 = arith.constant 0 : index
    %22 = vector.load %arg4[%21, %c0_13, %c0_14, %c0_15] : memref<8x1x1x128xf32, #tpu.memory_space<vmem>>, vector<1x1x1x128xf32>
    %23 = vector.shape_cast %22 : vector<1x1x1x128xf32> to vector<1x128xf32>
    %cst_16 = arith.constant 9.99999997E-7 : f32
    %cst_17 = arith.constant 0.999998986 : f32
    %24 = vector.broadcast %cst_16 : f32 to vector<1x128xf32>
    %25 = arith.maximumf %24, %23 : vector<1x128xf32>
    %26 = vector.broadcast %cst_17 : f32 to vector<1x128xf32>
    %27 = arith.minimumf %26, %25 : vector<1x128xf32>
    %28 = arith.index_cast %6 : i32 to index
    %c0_18 = arith.constant 0 : index
    %c0_19 = arith.constant 0 : index
    %c0_20 = arith.constant 0 : index
    %29 = vector.load %arg5[%28, %c0_18, %c0_19, %c0_20] : memref<8x1x1x128xf32, #tpu.memory_space<vmem>>, vector<1x1x1x128xf32>
    %30 = vector.shape_cast %29 : vector<1x1x1x128xf32> to vector<1x128xf32>
    %31 = arith.index_cast %6 : i32 to index
    %c0_21 = arith.constant 0 : index
    %c0_22 = arith.constant 0 : index
    %c0_23 = arith.constant 0 : index
    %32 = vector.load %arg8[%31, %c0_21, %c0_22, %c0_23] : memref<8x1x1x128xf32, #tpu.memory_space<vmem>>, vector<1x1x1x128xf32>
    %33 = vector.shape_cast %32 : vector<1x1x1x128xf32> to vector<1x128xf32>
    %34 = vector.shape_cast %3 : vector<1x128xf32> to vector<1x1x1x128xf32>
    tpu.vector_store %arg8[%31, %c0_21, %c0_22, %c0_23], %34 {strides = array<i32>} : memref<8x1x1x128xf32, #tpu.memory_space<vmem>>, vector<1x1x1x128xf32>,
    %cst_24 = arith.constant 1.000000e+00 : f32
    %35 = vector.broadcast %cst_24 : f32 to vector<1x128xf32>
    %36 = arith.subf %35, %3 : vector<1x128xf32>
    %cst_25 = arith.constant 1.000000e+00 : f32
    %37 = vector.broadcast %cst_25 : f32 to vector<1x128xf32>
    %38 = arith.subf %37, %27 : vector<1x128xf32>
    %39 = arith.mulf %3, %38 : vector<1x128xf32>
    %40 = arith.mulf %36, %20 : vector<1x128xf32>
    %41 = arith.addf %39, %40 : vector<1x128xf32>
    %42 = arith.index_cast %6 : i32 to index
    %c0_26 = arith.constant 0 : index
    %c0_27 = arith.constant 0 : index
    %c0_28 = arith.constant 0 : index
    %43 = vector.load %arg7[%42, %c0_26, %c0_27, %c0_28] : memref<8x1x1x128xf32, #tpu.memory_space<vmem>>, vector<1x1x1x128xf32>
    %44 = vector.shape_cast %43 : vector<1x1x1x128xf32> to vector<1x128xf32>
    %45 = vector.shape_cast %41 : vector<1x128xf32> to vector<1x1x1x128xf32>
    tpu.vector_store %arg7[%42, %c0_26, %c0_27, %c0_28], %45 {strides = array<i32>} : memref<8x1x1x128xf32, #tpu.memory_space<vmem>>, vector<1x1x1x128xf32>,
    %46 = tpu.reciprocal %41 {approx = true} : vector<1x128xf32> -> vector<1x128xf32>
    %47 = arith.mulf %39, %46 : vector<1x128xf32>
    %48 = arith.mulf %3, %27 : vector<1x128xf32>
    %cst_29 = arith.constant 1.000000e+00 : f32
    %49 = vector.broadcast %cst_29 : f32 to vector<1x128xf32>
    %50 = arith.subf %49, %20 : vector<1x128xf32>
    %51 = arith.mulf %36, %50 : vector<1x128xf32>
    %52 = arith.addf %48, %51 : vector<1x128xf32>
    %53 = tpu.reciprocal %52 {approx = true} : vector<1x128xf32> -> vector<1x128xf32>
    %54 = arith.mulf %48, %53 : vector<1x128xf32>
    %cst_30 = arith.constant 5.000000e-01 : f32
    %55 = vector.broadcast %cst_30 : f32 to vector<1x128xf32>
    %56 = arith.cmpf ogt, %30, %55 : vector<1x128xf32>
    %57 = arith.select %56, %47, %54 : vector<1x128xi1>, vector<1x128xf32>
    %cst_31 = arith.constant 1.000000e+00 : f32
    %58 = vector.broadcast %cst_31 : f32 to vector<1x128xf32>
    %59 = arith.subf %58, %57 : vector<1x128xf32>
    %60 = arith.mulf %59, %13 : vector<1x128xf32>
    %61 = arith.addf %57, %60 : vector<1x128xf32>
    %cst_32 = arith.constant 9.99999997E-7 : f32
    %cst_33 = arith.constant 0.999998986 : f32
    %62 = vector.broadcast %cst_32 : f32 to vector<1x128xf32>
    %63 = arith.maximumf %62, %61 : vector<1x128xf32>
    %64 = vector.broadcast %cst_33 : f32 to vector<1x128xf32>
    %65 = arith.minimumf %64, %63 : vector<1x128xf32>
    %c1_i32 = arith.constant 1 : i32
    %66 = arith.addi %5, %c1_i32 : i32
    %67 = arith.index_cast %66 : i32 to index
    %c0_34 = arith.constant 0 : index
    %c0_35 = arith.constant 0 : index
    %c0_36 = arith.constant 0 : index
    %68 = vector.load %arg2[%67, %c0_34, %c0_35, %c0_36] : memref<8x1x1x128xf32, #tpu.memory_space<vmem>>, vector<1x1x1x128xf32>
    %69 = vector.shape_cast %68 : vector<1x1x1x128xf32> to vector<1x128xf32>
    %cst_37 = arith.constant 9.99999997E-7 : f32
    %cst_38 = arith.constant 0.999998986 : f32
    %70 = vector.broadcast %cst_37 : f32 to vector<1x128xf32>
    %71 = arith.maximumf %70, %69 : vector<1x128xf32>
    %72 = vector.broadcast %cst_38 : f32 to vector<1x128xf32>
    %73 = arith.minimumf %72, %71 : vector<1x128xf32>
    %74 = arith.index_cast %66 : i32 to index
    %c0_39 = arith.constant 0 : index
    %c0_40 = arith.constant 0 : index
    %c0_41 = arith.constant 0 : index
    %75 = vector.load %arg3[%74, %c0_39, %c0_40, %c0_41] : memref<8x1x1x128xf32, #tpu.memory_space<vmem>>, vector<1x1x1x128xf32>
    %76 = vector.shape_cast %75 : vector<1x1x1x128xf32> to vector<1x128xf32>
    %cst_42 = arith.constant 9.99999997E-7 : f32
    %cst_43 = arith.constant 0.999998986 : f32
    %77 = vector.broadcast %cst_42 : f32 to vector<1x128xf32>
    %78 = arith.maximumf %77, %76 : vector<1x128xf32>
    %79 = vector.broadcast %cst_43 : f32 to vector<1x128xf32>
    %80 = arith.minimumf %79, %78 : vector<1x128xf32>
    %81 = arith.index_cast %66 : i32 to index
    %c0_44 = arith.constant 0 : index
    %c0_45 = arith.constant 0 : index
    %c0_46 = arith.constant 0 : index
    %82 = vector.load %arg4[%81, %c0_44, %c0_45, %c0_46] : memref<8x1x1x128xf32, #tpu.memory_space<vmem>>, vector<1x1x1x128xf32>
    %83 = vector.shape_cast %82 : vector<1x1x1x128xf32> to vector<1x128xf32>
    %cst_47 = arith.constant 9.99999997E-7 : f32
    %cst_48 = arith.constant 0.999998986 : f32
    %84 = vector.broadcast %cst_47 : f32 to vector<1x128xf32>
    %85 = arith.maximumf %84, %83 : vector<1x128xf32>
    %86 = vector.broadcast %cst_48 : f32 to vector<1x128xf32>
    %87 = arith.minimumf %86, %85 : vector<1x128xf32>
    %88 = arith.index_cast %66 : i32 to index
    %c0_49 = arith.constant 0 : index
    %c0_50 = arith.constant 0 : index
    %c0_51 = arith.constant 0 : index
    %89 = vector.load %arg5[%88, %c0_49, %c0_50, %c0_51] : memref<8x1x1x128xf32, #tpu.memory_space<vmem>>, vector<1x1x1x128xf32>
    %90 = vector.shape_cast %89 : vector<1x1x1x128xf32> to vector<1x128xf32>
    %91 = arith.index_cast %66 : i32 to index
    %c0_52 = arith.constant 0 : index
    %c0_53 = arith.constant 0 : index
    %c0_54 = arith.constant 0 : index
    %92 = vector.load %arg8[%91, %c0_52, %c0_53, %c0_54] : memref<8x1x1x128xf32, #tpu.memory_space<vmem>>, vector<1x1x1x128xf32>
    %93 = vector.shape_cast %92 : vector<1x1x1x128xf32> to vector<1x128xf32>
    %94 = vector.shape_cast %65 : vector<1x128xf32> to vector<1x1x1x128xf32>
    tpu.vector_store %arg8[%91, %c0_52, %c0_53, %c0_54], %94 {strides = array<i32>} : memref<8x1x1x128xf32, #tpu.memory_space<vmem>>, vector<1x1x1x128xf32>,
    %cst_55 = arith.constant 1.000000e+00 : f32
    %95 = vector.broadcast %cst_55 : f32 to vector<1x128xf32>
    %96 = arith.subf %95, %65 : vector<1x128xf32>
    %cst_56 = arith.constant 1.000000e+00 : f32
    %97 = vector.broadcast %cst_56 : f32 to vector<1x128xf32>
    %98 = arith.subf %97, %87 : vector<1x128xf32>
    %99 = arith.mulf %65, %98 : vector<1x128xf32>
    %100 = arith.mulf %96, %80 : vector<1x128xf32>
    %101 = arith.addf %99, %100 : vector<1x128xf32>
    %102 = arith.index_cast %66 : i32 to index
    %c0_57 = arith.constant 0 : index
    %c0_58 = arith.constant 0 : index
    %c0_59 = arith.constant 0 : index
    %103 = vector.load %arg7[%102, %c0_57, %c0_58, %c0_59] : memref<8x1x1x128xf32, #tpu.memory_space<vmem>>, vector<1x1x1x128xf32>
    %104 = vector.shape_cast %103 : vector<1x1x1x128xf32> to vector<1x128xf32>
    %105 = vector.shape_cast %101 : vector<1x128xf32> to vector<1x1x1x128xf32>
    tpu.vector_store %arg7[%102, %c0_57, %c0_58, %c0_59], %105 {strides = array<i32>} : memref<8x1x1x128xf32, #tpu.memory_space<vmem>>, vector<1x1x1x128xf32>,
    %106 = tpu.reciprocal %101 {approx = true} : vector<1x128xf32> -> vector<1x128xf32>
    %107 = arith.mulf %99, %106 : vector<1x128xf32>
    %108 = arith.mulf %65, %87 : vector<1x128xf32>
    %cst_60 = arith.constant 1.000000e+00 : f32
    %109 = vector.broadcast %cst_60 : f32 to vector<1x128xf32>
    %110 = arith.subf %109, %80 : vector<1x128xf32>
    %111 = arith.mulf %96, %110 : vector<1x128xf32>
    %112 = arith.addf %108, %111 : vector<1x128xf32>
    %113 = tpu.reciprocal %112 {approx = true} : vector<1x128xf32> -> vector<1x128xf32>
    %114 = arith.mulf %108, %113 : vector<1x128xf32>
    %cst_61 = arith.constant 5.000000e-01 : f32
    %115 = vector.broadcast %cst_61 : f32 to vector<1x128xf32>
    %116 = arith.cmpf ogt, %90, %115 : vector<1x128xf32>
    %117 = arith.select %116, %107, %114 : vector<1x128xi1>, vector<1x128xf32>
    %cst_62 = arith.constant 1.000000e+00 : f32
    %118 = vector.broadcast %cst_62 : f32 to vector<1x128xf32>
    %119 = arith.subf %118, %117 : vector<1x128xf32>
    %120 = arith.mulf %119, %73 : vector<1x128xf32>
    %121 = arith.addf %117, %120 : vector<1x128xf32>
    %cst_63 = arith.constant 9.99999997E-7 : f32
    %cst_64 = arith.constant 0.999998986 : f32
    %122 = vector.broadcast %cst_63 : f32 to vector<1x128xf32>
    %123 = arith.maximumf %122, %121 : vector<1x128xf32>
    %124 = vector.broadcast %cst_64 : f32 to vector<1x128xf32>
    %125 = arith.minimumf %124, %123 : vector<1x128xf32>
    %c2_i32 = arith.constant 2 : i32
    %126 = arith.addi %5, %c2_i32 : i32
    %127 = arith.index_cast %126 : i32 to index
    %c0_65 = arith.constant 0 : index
    %c0_66 = arith.constant 0 : index
    %c0_67 = arith.constant 0 : index
    %128 = vector.load %arg2[%127, %c0_65, %c0_66, %c0_67] : memref<8x1x1x128xf32, #tpu.memory_space<vmem>>, vector<1x1x1x128xf32>
    %129 = vector.shape_cast %128 : vector<1x1x1x128xf32> to vector<1x128xf32>
    %cst_68 = arith.constant 9.99999997E-7 : f32
    %cst_69 = arith.constant 0.999998986 : f32
    %130 = vector.broadcast %cst_68 : f32 to vector<1x128xf32>
    %131 = arith.maximumf %130, %129 : vector<1x128xf32>
    %132 = vector.broadcast %cst_69 : f32 to vector<1x128xf32>
    %133 = arith.minimumf %132, %131 : vector<1x128xf32>
    %134 = arith.index_cast %126 : i32 to index
    %c0_70 = arith.constant 0 : index
    %c0_71 = arith.constant 0 : index
    %c0_72 = arith.constant 0 : index
    %135 = vector.load %arg3[%134, %c0_70, %c0_71, %c0_72] : memref<8x1x1x128xf32, #tpu.memory_space<vmem>>, vector<1x1x1x128xf32>
    %136 = vector.shape_cast %135 : vector<1x1x1x128xf32> to vector<1x128xf32>
    %cst_73 = arith.constant 9.99999997E-7 : f32
    %cst_74 = arith.constant 0.999998986 : f32
    %137 = vector.broadcast %cst_73 : f32 to vector<1x128xf32>
    %138 = arith.maximumf %137, %136 : vector<1x128xf32>
    %139 = vector.broadcast %cst_74 : f32 to vector<1x128xf32>
    %140 = arith.minimumf %139, %138 : vector<1x128xf32>
    %141 = arith.index_cast %126 : i32 to index
    %c0_75 = arith.constant 0 : index
    %c0_76 = arith.constant 0 : index
    %c0_77 = arith.constant 0 : index
    %142 = vector.load %arg4[%141, %c0_75, %c0_76, %c0_77] : memref<8x1x1x128xf32, #tpu.memory_space<vmem>>, vector<1x1x1x128xf32>
    %143 = vector.shape_cast %142 : vector<1x1x1x128xf32> to vector<1x128xf32>
    %cst_78 = arith.constant 9.99999997E-7 : f32
    %cst_79 = arith.constant 0.999998986 : f32
    %144 = vector.broadcast %cst_78 : f32 to vector<1x128xf32>
    %145 = arith.maximumf %144, %143 : vector<1x128xf32>
    %146 = vector.broadcast %cst_79 : f32 to vector<1x128xf32>
    %147 = arith.minimumf %146, %145 : vector<1x128xf32>
    %148 = arith.index_cast %126 : i32 to index
    %c0_80 = arith.constant 0 : index
    %c0_81 = arith.constant 0 : index
    %c0_82 = arith.constant 0 : index
    %149 = vector.load %arg5[%148, %c0_80, %c0_81, %c0_82] : memref<8x1x1x128xf32, #tpu.memory_space<vmem>>, vector<1x1x1x128xf32>
    %150 = vector.shape_cast %149 : vector<1x1x1x128xf32> to vector<1x128xf32>
    %151 = arith.index_cast %126 : i32 to index
    %c0_83 = arith.constant 0 : index
    %c0_84 = arith.constant 0 : index
    %c0_85 = arith.constant 0 : index
    %152 = vector.load %arg8[%151, %c0_83, %c0_84, %c0_85] : memref<8x1x1x128xf32, #tpu.memory_space<vmem>>, vector<1x1x1x128xf32>
    %153 = vector.shape_cast %152 : vector<1x1x1x128xf32> to vector<1x128xf32>
    %154 = vector.shape_cast %125 : vector<1x128xf32> to vector<1x1x1x128xf32>
    tpu.vector_store %arg8[%151, %c0_83, %c0_84, %c0_85], %154 {strides = array<i32>} : memref<8x1x1x128xf32, #tpu.memory_space<vmem>>, vector<1x1x1x128xf32>,
    %cst_86 = arith.constant 1.000000e+00 : f32
    %155 = vector.broadcast %cst_86 : f32 to vector<1x128xf32>
    %156 = arith.subf %155, %125 : vector<1x128xf32>
    %cst_87 = arith.constant 1.000000e+00 : f32
    %157 = vector.broadcast %cst_87 : f32 to vector<1x128xf32>
    %158 = arith.subf %157, %147 : vector<1x128xf32>
    %159 = arith.mulf %125, %158 : vector<1x128xf32>
    %160 = arith.mulf %156, %140 : vector<1x128xf32>
    %161 = arith.addf %159, %160 : vector<1x128xf32>
    %162 = arith.index_cast %126 : i32 to index
    %c0_88 = arith.constant 0 : index
    %c0_89 = arith.constant 0 : index
    %c0_90 = arith.constant 0 : index
    %163 = vector.load %arg7[%162, %c0_88, %c0_89, %c0_90] : memref<8x1x1x128xf32, #tpu.memory_space<vmem>>, vector<1x1x1x128xf32>
    %164 = vector.shape_cast %163 : vector<1x1x1x128xf32> to vector<1x128xf32>
    %165 = vector.shape_cast %161 : vector<1x128xf32> to vector<1x1x1x128xf32>
    tpu.vector_store %arg7[%162, %c0_88, %c0_89, %c0_90], %165 {strides = array<i32>} : memref<8x1x1x128xf32, #tpu.memory_space<vmem>>, vector<1x1x1x128xf32>,
    %166 = tpu.reciprocal %161 {approx = true} : vector<1x128xf32> -> vector<1x128xf32>
    %167 = arith.mulf %159, %166 : vector<1x128xf32>
    %168 = arith.mulf %125, %147 : vector<1x128xf32>
    %cst_91 = arith.constant 1.000000e+00 : f32
    %169 = vector.broadcast %cst_91 : f32 to vector<1x128xf32>
    %170 = arith.subf %169, %140 : vector<1x128xf32>
    %171 = arith.mulf %156, %170 : vector<1x128xf32>
    %172 = arith.addf %168, %171 : vector<1x128xf32>
    %173 = tpu.reciprocal %172 {approx = true} : vector<1x128xf32> -> vector<1x128xf32>
    %174 = arith.mulf %168, %173 : vector<1x128xf32>
    %cst_92 = arith.constant 5.000000e-01 : f32
    %175 = vector.broadcast %cst_92 : f32 to vector<1x128xf32>
    %176 = arith.cmpf ogt, %150, %175 : vector<1x128xf32>
    %177 = arith.select %176, %167, %174 : vector<1x128xi1>, vector<1x128xf32>
    %cst_93 = arith.constant 1.000000e+00 : f32
    %178 = vector.broadcast %cst_93 : f32 to vector<1x128xf32>
    %179 = arith.subf %178, %177 : vector<1x128xf32>
    %180 = arith.mulf %179, %133 : vector<1x128xf32>
    %181 = arith.addf %177, %180 : vector<1x128xf32>
    %cst_94 = arith.constant 9.99999997E-7 : f32
    %cst_95 = arith.constant 0.999998986 : f32
    %182 = vector.broadcast %cst_94 : f32 to vector<1x128xf32>
    %183 = arith.maximumf %182, %181 : vector<1x128xf32>
    %184 = vector.broadcast %cst_95 : f32 to vector<1x128xf32>
    %185 = arith.minimumf %184, %183 : vector<1x128xf32>
    %c3_i32 = arith.constant 3 : i32
    %186 = arith.addi %5, %c3_i32 : i32
    %187 = arith.index_cast %186 : i32 to index
    %c0_96 = arith.constant 0 : index
    %c0_97 = arith.constant 0 : index
    %c0_98 = arith.constant 0 : index
    %188 = vector.load %arg2[%187, %c0_96, %c0_97, %c0_98] : memref<8x1x1x128xf32, #tpu.memory_space<vmem>>, vector<1x1x1x128xf32>
    %189 = vector.shape_cast %188 : vector<1x1x1x128xf32> to vector<1x128xf32>
    %cst_99 = arith.constant 9.99999997E-7 : f32
    %cst_100 = arith.constant 0.999998986 : f32
    %190 = vector.broadcast %cst_99 : f32 to vector<1x128xf32>
    %191 = arith.maximumf %190, %189 : vector<1x128xf32>
    %192 = vector.broadcast %cst_100 : f32 to vector<1x128xf32>
    %193 = arith.minimumf %192, %191 : vector<1x128xf32>
    %194 = arith.index_cast %186 : i32 to index
    %c0_101 = arith.constant 0 : index
    %c0_102 = arith.constant 0 : index
    %c0_103 = arith.constant 0 : index
    %195 = vector.load %arg3[%194, %c0_101, %c0_102, %c0_103] : memref<8x1x1x128xf32, #tpu.memory_space<vmem>>, vector<1x1x1x128xf32>
    %196 = vector.shape_cast %195 : vector<1x1x1x128xf32> to vector<1x128xf32>
    %cst_104 = arith.constant 9.99999997E-7 : f32
    %cst_105 = arith.constant 0.999998986 : f32
    %197 = vector.broadcast %cst_104 : f32 to vector<1x128xf32>
    %198 = arith.maximumf %197, %196 : vector<1x128xf32>
    %199 = vector.broadcast %cst_105 : f32 to vector<1x128xf32>
    %200 = arith.minimumf %199, %198 : vector<1x128xf32>
    %201 = arith.index_cast %186 : i32 to index
    %c0_106 = arith.constant 0 : index
    %c0_107 = arith.constant 0 : index
    %c0_108 = arith.constant 0 : index
    %202 = vector.load %arg4[%201, %c0_106, %c0_107, %c0_108] : memref<8x1x1x128xf32, #tpu.memory_space<vmem>>, vector<1x1x1x128xf32>
    %203 = vector.shape_cast %202 : vector<1x1x1x128xf32> to vector<1x128xf32>
    %cst_109 = arith.constant 9.99999997E-7 : f32
    %cst_110 = arith.constant 0.999998986 : f32
    %204 = vector.broadcast %cst_109 : f32 to vector<1x128xf32>
    %205 = arith.maximumf %204, %203 : vector<1x128xf32>
    %206 = vector.broadcast %cst_110 : f32 to vector<1x128xf32>
    %207 = arith.minimumf %206, %205 : vector<1x128xf32>
    %208 = arith.index_cast %186 : i32 to index
    %c0_111 = arith.constant 0 : index
    %c0_112 = arith.constant 0 : index
    %c0_113 = arith.constant 0 : index
    %209 = vector.load %arg5[%208, %c0_111, %c0_112, %c0_113] : memref<8x1x1x128xf32, #tpu.memory_space<vmem>>, vector<1x1x1x128xf32>
    %210 = vector.shape_cast %209 : vector<1x1x1x128xf32> to vector<1x128xf32>
    %211 = arith.index_cast %186 : i32 to index
    %c0_114 = arith.constant 0 : index
    %c0_115 = arith.constant 0 : index
    %c0_116 = arith.constant 0 : index
    %212 = vector.load %arg8[%211, %c0_114, %c0_115, %c0_116] : memref<8x1x1x128xf32, #tpu.memory_space<vmem>>, vector<1x1x1x128xf32>
    %213 = vector.shape_cast %212 : vector<1x1x1x128xf32> to vector<1x128xf32>
    %214 = vector.shape_cast %185 : vector<1x128xf32> to vector<1x1x1x128xf32>
    tpu.vector_store %arg8[%211, %c0_114, %c0_115, %c0_116], %214 {strides = array<i32>} : memref<8x1x1x128xf32, #tpu.memory_space<vmem>>, vector<1x1x1x128xf32>,
    %cst_117 = arith.constant 1.000000e+00 : f32
    %215 = vector.broadcast %cst_117 : f32 to vector<1x128xf32>
    %216 = arith.subf %215, %185 : vector<1x128xf32>
    %cst_118 = arith.constant 1.000000e+00 : f32
    %217 = vector.broadcast %cst_118 : f32 to vector<1x128xf32>
    %218 = arith.subf %217, %207 : vector<1x128xf32>
    %219 = arith.mulf %185, %218 : vector<1x128xf32>
    %220 = arith.mulf %216, %200 : vector<1x128xf32>
    %221 = arith.addf %219, %220 : vector<1x128xf32>
    %222 = arith.index_cast %186 : i32 to index
    %c0_119 = arith.constant 0 : index
    %c0_120 = arith.constant 0 : index
    %c0_121 = arith.constant 0 : index
    %223 = vector.load %arg7[%222, %c0_119, %c0_120, %c0_121] : memref<8x1x1x128xf32, #tpu.memory_space<vmem>>, vector<1x1x1x128xf32>
    %224 = vector.shape_cast %223 : vector<1x1x1x128xf32> to vector<1x128xf32>
    %225 = vector.shape_cast %221 : vector<1x128xf32> to vector<1x1x1x128xf32>
    tpu.vector_store %arg7[%222, %c0_119, %c0_120, %c0_121], %225 {strides = array<i32>} : memref<8x1x1x128xf32, #tpu.memory_space<vmem>>, vector<1x1x1x128xf32>,
    %226 = tpu.reciprocal %221 {approx = true} : vector<1x128xf32> -> vector<1x128xf32>
    %227 = arith.mulf %219, %226 : vector<1x128xf32>
    %228 = arith.mulf %185, %207 : vector<1x128xf32>
    %cst_122 = arith.constant 1.000000e+00 : f32
    %229 = vector.broadcast %cst_122 : f32 to vector<1x128xf32>
    %230 = arith.subf %229, %200 : vector<1x128xf32>
    %231 = arith.mulf %216, %230 : vector<1x128xf32>
    %232 = arith.addf %228, %231 : vector<1x128xf32>
    %233 = tpu.reciprocal %232 {approx = true} : vector<1x128xf32> -> vector<1x128xf32>
    %234 = arith.mulf %228, %233 : vector<1x128xf32>
    %cst_123 = arith.constant 5.000000e-01 : f32
    %235 = vector.broadcast %cst_123 : f32 to vector<1x128xf32>
    %236 = arith.cmpf ogt, %210, %235 : vector<1x128xf32>
    %237 = arith.select %236, %227, %234 : vector<1x128xi1>, vector<1x128xf32>
    %cst_124 = arith.constant 1.000000e+00 : f32
    %238 = vector.broadcast %cst_124 : f32 to vector<1x128xf32>
    %239 = arith.subf %238, %237 : vector<1x128xf32>
    %240 = arith.mulf %239, %193 : vector<1x128xf32>
    %241 = arith.addf %237, %240 : vector<1x128xf32>
    %cst_125 = arith.constant 9.99999997E-7 : f32
    %cst_126 = arith.constant 0.999998986 : f32
    %242 = vector.broadcast %cst_125 : f32 to vector<1x128xf32>
    %243 = arith.maximumf %242, %241 : vector<1x128xf32>
    %244 = vector.broadcast %cst_126 : f32 to vector<1x128xf32>
    %245 = arith.minimumf %244, %243 : vector<1x128xf32>
    %c4_i32 = arith.constant 4 : i32
    %246 = arith.addi %5, %c4_i32 : i32
    %247 = arith.index_cast %246 : i32 to index
    %c0_127 = arith.constant 0 : index
    %c0_128 = arith.constant 0 : index
    %c0_129 = arith.constant 0 : index
    %248 = vector.load %arg2[%247, %c0_127, %c0_128, %c0_129] : memref<8x1x1x128xf32, #tpu.memory_space<vmem>>, vector<1x1x1x128xf32>
    %249 = vector.shape_cast %248 : vector<1x1x1x128xf32> to vector<1x128xf32>
    %cst_130 = arith.constant 9.99999997E-7 : f32
    %cst_131 = arith.constant 0.999998986 : f32
    %250 = vector.broadcast %cst_130 : f32 to vector<1x128xf32>
    %251 = arith.maximumf %250, %249 : vector<1x128xf32>
    %252 = vector.broadcast %cst_131 : f32 to vector<1x128xf32>
    %253 = arith.minimumf %252, %251 : vector<1x128xf32>
    %254 = arith.index_cast %246 : i32 to index
    %c0_132 = arith.constant 0 : index
    %c0_133 = arith.constant 0 : index
    %c0_134 = arith.constant 0 : index
    %255 = vector.load %arg3[%254, %c0_132, %c0_133, %c0_134] : memref<8x1x1x128xf32, #tpu.memory_space<vmem>>, vector<1x1x1x128xf32>
    %256 = vector.shape_cast %255 : vector<1x1x1x128xf32> to vector<1x128xf32>
    %cst_135 = arith.constant 9.99999997E-7 : f32
    %cst_136 = arith.constant 0.999998986 : f32
    %257 = vector.broadcast %cst_135 : f32 to vector<1x128xf32>
    %258 = arith.maximumf %257, %256 : vector<1x128xf32>
    %259 = vector.broadcast %cst_136 : f32 to vector<1x128xf32>
    %260 = arith.minimumf %259, %258 : vector<1x128xf32>
    %261 = arith.index_cast %246 : i32 to index
    %c0_137 = arith.constant 0 : index
    %c0_138 = arith.constant 0 : index
    %c0_139 = arith.constant 0 : index
    %262 = vector.load %arg4[%261, %c0_137, %c0_138, %c0_139] : memref<8x1x1x128xf32, #tpu.memory_space<vmem>>, vector<1x1x1x128xf32>
    %263 = vector.shape_cast %262 : vector<1x1x1x128xf32> to vector<1x128xf32>
    %cst_140 = arith.constant 9.99999997E-7 : f32
    %cst_141 = arith.constant 0.999998986 : f32
    %264 = vector.broadcast %cst_140 : f32 to vector<1x128xf32>
    %265 = arith.maximumf %264, %263 : vector<1x128xf32>
    %266 = vector.broadcast %cst_141 : f32 to vector<1x128xf32>
    %267 = arith.minimumf %266, %265 : vector<1x128xf32>
    %268 = arith.index_cast %246 : i32 to index
    %c0_142 = arith.constant 0 : index
    %c0_143 = arith.constant 0 : index
    %c0_144 = arith.constant 0 : index
    %269 = vector.load %arg5[%268, %c0_142, %c0_143, %c0_144] : memref<8x1x1x128xf32, #tpu.memory_space<vmem>>, vector<1x1x1x128xf32>
    %270 = vector.shape_cast %269 : vector<1x1x1x128xf32> to vector<1x128xf32>
    %271 = arith.index_cast %246 : i32 to index
    %c0_145 = arith.constant 0 : index
    %c0_146 = arith.constant 0 : index
    %c0_147 = arith.constant 0 : index
    %272 = vector.load %arg8[%271, %c0_145, %c0_146, %c0_147] : memref<8x1x1x128xf32, #tpu.memory_space<vmem>>, vector<1x1x1x128xf32>
    %273 = vector.shape_cast %272 : vector<1x1x1x128xf32> to vector<1x128xf32>
    %274 = vector.shape_cast %245 : vector<1x128xf32> to vector<1x1x1x128xf32>
    tpu.vector_store %arg8[%271, %c0_145, %c0_146, %c0_147], %274 {strides = array<i32>} : memref<8x1x1x128xf32, #tpu.memory_space<vmem>>, vector<1x1x1x128xf32>,
    %cst_148 = arith.constant 1.000000e+00 : f32
    %275 = vector.broadcast %cst_148 : f32 to vector<1x128xf32>
    %276 = arith.subf %275, %245 : vector<1x128xf32>
    %cst_149 = arith.constant 1.000000e+00 : f32
    %277 = vector.broadcast %cst_149 : f32 to vector<1x128xf32>
    %278 = arith.subf %277, %267 : vector<1x128xf32>
    %279 = arith.mulf %245, %278 : vector<1x128xf32>
    %280 = arith.mulf %276, %260 : vector<1x128xf32>
    %281 = arith.addf %279, %280 : vector<1x128xf32>
    %282 = arith.index_cast %246 : i32 to index
    %c0_150 = arith.constant 0 : index
    %c0_151 = arith.constant 0 : index
    %c0_152 = arith.constant 0 : index
    %283 = vector.load %arg7[%282, %c0_150, %c0_151, %c0_152] : memref<8x1x1x128xf32, #tpu.memory_space<vmem>>, vector<1x1x1x128xf32>
    %284 = vector.shape_cast %283 : vector<1x1x1x128xf32> to vector<1x128xf32>
    %285 = vector.shape_cast %281 : vector<1x128xf32> to vector<1x1x1x128xf32>
    tpu.vector_store %arg7[%282, %c0_150, %c0_151, %c0_152], %285 {strides = array<i32>} : memref<8x1x1x128xf32, #tpu.memory_space<vmem>>, vector<1x1x1x128xf32>,
    %286 = tpu.reciprocal %281 {approx = true} : vector<1x128xf32> -> vector<1x128xf32>
    %287 = arith.mulf %279, %286 : vector<1x128xf32>
    %288 = arith.mulf %245, %267 : vector<1x128xf32>
    %cst_153 = arith.constant 1.000000e+00 : f32
    %289 = vector.broadcast %cst_153 : f32 to vector<1x128xf32>
    %290 = arith.subf %289, %260 : vector<1x128xf32>
    %291 = arith.mulf %276, %290 : vector<1x128xf32>
    %292 = arith.addf %288, %291 : vector<1x128xf32>
    %293 = tpu.reciprocal %292 {approx = true} : vector<1x128xf32> -> vector<1x128xf32>
    %294 = arith.mulf %288, %293 : vector<1x128xf32>
    %cst_154 = arith.constant 5.000000e-01 : f32
    %295 = vector.broadcast %cst_154 : f32 to vector<1x128xf32>
    %296 = arith.cmpf ogt, %270, %295 : vector<1x128xf32>
    %297 = arith.select %296, %287, %294 : vector<1x128xi1>, vector<1x128xf32>
    %cst_155 = arith.constant 1.000000e+00 : f32
    %298 = vector.broadcast %cst_155 : f32 to vector<1x128xf32>
    %299 = arith.subf %298, %297 : vector<1x128xf32>
    %300 = arith.mulf %299, %253 : vector<1x128xf32>
    %301 = arith.addf %297, %300 : vector<1x128xf32>
    %cst_156 = arith.constant 9.99999997E-7 : f32
    %cst_157 = arith.constant 0.999998986 : f32
    %302 = vector.broadcast %cst_156 : f32 to vector<1x128xf32>
    %303 = arith.maximumf %302, %301 : vector<1x128xf32>
    %304 = vector.broadcast %cst_157 : f32 to vector<1x128xf32>
    %305 = arith.minimumf %304, %303 : vector<1x128xf32>
    %c5_i32 = arith.constant 5 : i32
    %306 = arith.addi %5, %c5_i32 : i32
    %307 = arith.index_cast %306 : i32 to index
    %c0_158 = arith.constant 0 : index
    %c0_159 = arith.constant 0 : index
    %c0_160 = arith.constant 0 : index
    %308 = vector.load %arg2[%307, %c0_158, %c0_159, %c0_160] : memref<8x1x1x128xf32, #tpu.memory_space<vmem>>, vector<1x1x1x128xf32>
    %309 = vector.shape_cast %308 : vector<1x1x1x128xf32> to vector<1x128xf32>
    %cst_161 = arith.constant 9.99999997E-7 : f32
    %cst_162 = arith.constant 0.999998986 : f32
    %310 = vector.broadcast %cst_161 : f32 to vector<1x128xf32>
    %311 = arith.maximumf %310, %309 : vector<1x128xf32>
    %312 = vector.broadcast %cst_162 : f32 to vector<1x128xf32>
    %313 = arith.minimumf %312, %311 : vector<1x128xf32>
    %314 = arith.index_cast %306 : i32 to index
    %c0_163 = arith.constant 0 : index
    %c0_164 = arith.constant 0 : index
    %c0_165 = arith.constant 0 : index
    %315 = vector.load %arg3[%314, %c0_163, %c0_164, %c0_165] : memref<8x1x1x128xf32, #tpu.memory_space<vmem>>, vector<1x1x1x128xf32>
    %316 = vector.shape_cast %315 : vector<1x1x1x128xf32> to vector<1x128xf32>
    %cst_166 = arith.constant 9.99999997E-7 : f32
    %cst_167 = arith.constant 0.999998986 : f32
    %317 = vector.broadcast %cst_166 : f32 to vector<1x128xf32>
    %318 = arith.maximumf %317, %316 : vector<1x128xf32>
    %319 = vector.broadcast %cst_167 : f32 to vector<1x128xf32>
    %320 = arith.minimumf %319, %318 : vector<1x128xf32>
    %321 = arith.index_cast %306 : i32 to index
    %c0_168 = arith.constant 0 : index
    %c0_169 = arith.constant 0 : index
    %c0_170 = arith.constant 0 : index
    %322 = vector.load %arg4[%321, %c0_168, %c0_169, %c0_170] : memref<8x1x1x128xf32, #tpu.memory_space<vmem>>, vector<1x1x1x128xf32>
    %323 = vector.shape_cast %322 : vector<1x1x1x128xf32> to vector<1x128xf32>
    %cst_171 = arith.constant 9.99999997E-7 : f32
    %cst_172 = arith.constant 0.999998986 : f32
    %324 = vector.broadcast %cst_171 : f32 to vector<1x128xf32>
    %325 = arith.maximumf %324, %323 : vector<1x128xf32>
    %326 = vector.broadcast %cst_172 : f32 to vector<1x128xf32>
    %327 = arith.minimumf %326, %325 : vector<1x128xf32>
    %328 = arith.index_cast %306 : i32 to index
    %c0_173 = arith.constant 0 : index
    %c0_174 = arith.constant 0 : index
    %c0_175 = arith.constant 0 : index
    %329 = vector.load %arg5[%328, %c0_173, %c0_174, %c0_175] : memref<8x1x1x128xf32, #tpu.memory_space<vmem>>, vector<1x1x1x128xf32>
    %330 = vector.shape_cast %329 : vector<1x1x1x128xf32> to vector<1x128xf32>
    %331 = arith.index_cast %306 : i32 to index
    %c0_176 = arith.constant 0 : index
    %c0_177 = arith.constant 0 : index
    %c0_178 = arith.constant 0 : index
    %332 = vector.load %arg8[%331, %c0_176, %c0_177, %c0_178] : memref<8x1x1x128xf32, #tpu.memory_space<vmem>>, vector<1x1x1x128xf32>
    %333 = vector.shape_cast %332 : vector<1x1x1x128xf32> to vector<1x128xf32>
    %334 = vector.shape_cast %305 : vector<1x128xf32> to vector<1x1x1x128xf32>
    tpu.vector_store %arg8[%331, %c0_176, %c0_177, %c0_178], %334 {strides = array<i32>} : memref<8x1x1x128xf32, #tpu.memory_space<vmem>>, vector<1x1x1x128xf32>,
    %cst_179 = arith.constant 1.000000e+00 : f32
    %335 = vector.broadcast %cst_179 : f32 to vector<1x128xf32>
    %336 = arith.subf %335, %305 : vector<1x128xf32>
    %cst_180 = arith.constant 1.000000e+00 : f32
    %337 = vector.broadcast %cst_180 : f32 to vector<1x128xf32>
    %338 = arith.subf %337, %327 : vector<1x128xf32>
    %339 = arith.mulf %305, %338 : vector<1x128xf32>
    %340 = arith.mulf %336, %320 : vector<1x128xf32>
    %341 = arith.addf %339, %340 : vector<1x128xf32>
    %342 = arith.index_cast %306 : i32 to index
    %c0_181 = arith.constant 0 : index
    %c0_182 = arith.constant 0 : index
    %c0_183 = arith.constant 0 : index
    %343 = vector.load %arg7[%342, %c0_181, %c0_182, %c0_183] : memref<8x1x1x128xf32, #tpu.memory_space<vmem>>, vector<1x1x1x128xf32>
    %344 = vector.shape_cast %343 : vector<1x1x1x128xf32> to vector<1x128xf32>
    %345 = vector.shape_cast %341 : vector<1x128xf32> to vector<1x1x1x128xf32>
    tpu.vector_store %arg7[%342, %c0_181, %c0_182, %c0_183], %345 {strides = array<i32>} : memref<8x1x1x128xf32, #tpu.memory_space<vmem>>, vector<1x1x1x128xf32>,
    %346 = tpu.reciprocal %341 {approx = true} : vector<1x128xf32> -> vector<1x128xf32>
    %347 = arith.mulf %339, %346 : vector<1x128xf32>
    %348 = arith.mulf %305, %327 : vector<1x128xf32>
    %cst_184 = arith.constant 1.000000e+00 : f32
    %349 = vector.broadcast %cst_184 : f32 to vector<1x128xf32>
    %350 = arith.subf %349, %320 : vector<1x128xf32>
    %351 = arith.mulf %336, %350 : vector<1x128xf32>
    %352 = arith.addf %348, %351 : vector<1x128xf32>
    %353 = tpu.reciprocal %352 {approx = true} : vector<1x128xf32> -> vector<1x128xf32>
    %354 = arith.mulf %348, %353 : vector<1x128xf32>
    %cst_185 = arith.constant 5.000000e-01 : f32
    %355 = vector.broadcast %cst_185 : f32 to vector<1x128xf32>
    %356 = arith.cmpf ogt, %330, %355 : vector<1x128xf32>
    %357 = arith.select %356, %347, %354 : vector<1x128xi1>, vector<1x128xf32>
    %cst_186 = arith.constant 1.000000e+00 : f32
    %358 = vector.broadcast %cst_186 : f32 to vector<1x128xf32>
    %359 = arith.subf %358, %357 : vector<1x128xf32>
    %360 = arith.mulf %359, %313 : vector<1x128xf32>
    %361 = arith.addf %357, %360 : vector<1x128xf32>
    %cst_187 = arith.constant 9.99999997E-7 : f32
    %cst_188 = arith.constant 0.999998986 : f32
    %362 = vector.broadcast %cst_187 : f32 to vector<1x128xf32>
    %363 = arith.maximumf %362, %361 : vector<1x128xf32>
    %364 = vector.broadcast %cst_188 : f32 to vector<1x128xf32>
    %365 = arith.minimumf %364, %363 : vector<1x128xf32>
    %c6_i32 = arith.constant 6 : i32
    %366 = arith.addi %5, %c6_i32 : i32
    %367 = arith.index_cast %366 : i32 to index
    %c0_189 = arith.constant 0 : index
    %c0_190 = arith.constant 0 : index
    %c0_191 = arith.constant 0 : index
    %368 = vector.load %arg2[%367, %c0_189, %c0_190, %c0_191] : memref<8x1x1x128xf32, #tpu.memory_space<vmem>>, vector<1x1x1x128xf32>
    %369 = vector.shape_cast %368 : vector<1x1x1x128xf32> to vector<1x128xf32>
    %cst_192 = arith.constant 9.99999997E-7 : f32
    %cst_193 = arith.constant 0.999998986 : f32
    %370 = vector.broadcast %cst_192 : f32 to vector<1x128xf32>
    %371 = arith.maximumf %370, %369 : vector<1x128xf32>
    %372 = vector.broadcast %cst_193 : f32 to vector<1x128xf32>
    %373 = arith.minimumf %372, %371 : vector<1x128xf32>
    %374 = arith.index_cast %366 : i32 to index
    %c0_194 = arith.constant 0 : index
    %c0_195 = arith.constant 0 : index
    %c0_196 = arith.constant 0 : index
    %375 = vector.load %arg3[%374, %c0_194, %c0_195, %c0_196] : memref<8x1x1x128xf32, #tpu.memory_space<vmem>>, vector<1x1x1x128xf32>
    %376 = vector.shape_cast %375 : vector<1x1x1x128xf32> to vector<1x128xf32>
    %cst_197 = arith.constant 9.99999997E-7 : f32
    %cst_198 = arith.constant 0.999998986 : f32
    %377 = vector.broadcast %cst_197 : f32 to vector<1x128xf32>
    %378 = arith.maximumf %377, %376 : vector<1x128xf32>
    %379 = vector.broadcast %cst_198 : f32 to vector<1x128xf32>
    %380 = arith.minimumf %379, %378 : vector<1x128xf32>
    %381 = arith.index_cast %366 : i32 to index
    %c0_199 = arith.constant 0 : index
    %c0_200 = arith.constant 0 : index
    %c0_201 = arith.constant 0 : index
    %382 = vector.load %arg4[%381, %c0_199, %c0_200, %c0_201] : memref<8x1x1x128xf32, #tpu.memory_space<vmem>>, vector<1x1x1x128xf32>
    %383 = vector.shape_cast %382 : vector<1x1x1x128xf32> to vector<1x128xf32>
    %cst_202 = arith.constant 9.99999997E-7 : f32
    %cst_203 = arith.constant 0.999998986 : f32
    %384 = vector.broadcast %cst_202 : f32 to vector<1x128xf32>
    %385 = arith.maximumf %384, %383 : vector<1x128xf32>
    %386 = vector.broadcast %cst_203 : f32 to vector<1x128xf32>
    %387 = arith.minimumf %386, %385 : vector<1x128xf32>
    %388 = arith.index_cast %366 : i32 to index
    %c0_204 = arith.constant 0 : index
    %c0_205 = arith.constant 0 : index
    %c0_206 = arith.constant 0 : index
    %389 = vector.load %arg5[%388, %c0_204, %c0_205, %c0_206] : memref<8x1x1x128xf32, #tpu.memory_space<vmem>>, vector<1x1x1x128xf32>
    %390 = vector.shape_cast %389 : vector<1x1x1x128xf32> to vector<1x128xf32>
    %391 = arith.index_cast %366 : i32 to index
    %c0_207 = arith.constant 0 : index
    %c0_208 = arith.constant 0 : index
    %c0_209 = arith.constant 0 : index
    %392 = vector.load %arg8[%391, %c0_207, %c0_208, %c0_209] : memref<8x1x1x128xf32, #tpu.memory_space<vmem>>, vector<1x1x1x128xf32>
    %393 = vector.shape_cast %392 : vector<1x1x1x128xf32> to vector<1x128xf32>
    %394 = vector.shape_cast %365 : vector<1x128xf32> to vector<1x1x1x128xf32>
    tpu.vector_store %arg8[%391, %c0_207, %c0_208, %c0_209], %394 {strides = array<i32>} : memref<8x1x1x128xf32, #tpu.memory_space<vmem>>, vector<1x1x1x128xf32>,
    %cst_210 = arith.constant 1.000000e+00 : f32
    %395 = vector.broadcast %cst_210 : f32 to vector<1x128xf32>
    %396 = arith.subf %395, %365 : vector<1x128xf32>
    %cst_211 = arith.constant 1.000000e+00 : f32
    %397 = vector.broadcast %cst_211 : f32 to vector<1x128xf32>
    %398 = arith.subf %397, %387 : vector<1x128xf32>
    %399 = arith.mulf %365, %398 : vector<1x128xf32>
    %400 = arith.mulf %396, %380 : vector<1x128xf32>
    %401 = arith.addf %399, %400 : vector<1x128xf32>
    %402 = arith.index_cast %366 : i32 to index
    %c0_212 = arith.constant 0 : index
    %c0_213 = arith.constant 0 : index
    %c0_214 = arith.constant 0 : index
    %403 = vector.load %arg7[%402, %c0_212, %c0_213, %c0_214] : memref<8x1x1x128xf32, #tpu.memory_space<vmem>>, vector<1x1x1x128xf32>
    %404 = vector.shape_cast %403 : vector<1x1x1x128xf32> to vector<1x128xf32>
    %405 = vector.shape_cast %401 : vector<1x128xf32> to vector<1x1x1x128xf32>
    tpu.vector_store %arg7[%402, %c0_212, %c0_213, %c0_214], %405 {strides = array<i32>} : memref<8x1x1x128xf32, #tpu.memory_space<vmem>>, vector<1x1x1x128xf32>,
    %406 = tpu.reciprocal %401 {approx = true} : vector<1x128xf32> -> vector<1x128xf32>
    %407 = arith.mulf %399, %406 : vector<1x128xf32>
    %408 = arith.mulf %365, %387 : vector<1x128xf32>
    %cst_215 = arith.constant 1.000000e+00 : f32
    %409 = vector.broadcast %cst_215 : f32 to vector<1x128xf32>
    %410 = arith.subf %409, %380 : vector<1x128xf32>
    %411 = arith.mulf %396, %410 : vector<1x128xf32>
    %412 = arith.addf %408, %411 : vector<1x128xf32>
    %413 = tpu.reciprocal %412 {approx = true} : vector<1x128xf32> -> vector<1x128xf32>
    %414 = arith.mulf %408, %413 : vector<1x128xf32>
    %cst_216 = arith.constant 5.000000e-01 : f32
    %415 = vector.broadcast %cst_216 : f32 to vector<1x128xf32>
    %416 = arith.cmpf ogt, %390, %415 : vector<1x128xf32>
    %417 = arith.select %416, %407, %414 : vector<1x128xi1>, vector<1x128xf32>
    %cst_217 = arith.constant 1.000000e+00 : f32
    %418 = vector.broadcast %cst_217 : f32 to vector<1x128xf32>
    %419 = arith.subf %418, %417 : vector<1x128xf32>
    %420 = arith.mulf %419, %373 : vector<1x128xf32>
    %421 = arith.addf %417, %420 : vector<1x128xf32>
    %cst_218 = arith.constant 9.99999997E-7 : f32
    %cst_219 = arith.constant 0.999998986 : f32
    %422 = vector.broadcast %cst_218 : f32 to vector<1x128xf32>
    %423 = arith.maximumf %422, %421 : vector<1x128xf32>
    %424 = vector.broadcast %cst_219 : f32 to vector<1x128xf32>
    %425 = arith.minimumf %424, %423 : vector<1x128xf32>
    %c7_i32 = arith.constant 7 : i32
    %426 = arith.addi %5, %c7_i32 : i32
    %427 = arith.index_cast %426 : i32 to index
    %c0_220 = arith.constant 0 : index
    %c0_221 = arith.constant 0 : index
    %c0_222 = arith.constant 0 : index
    %428 = vector.load %arg2[%427, %c0_220, %c0_221, %c0_222] : memref<8x1x1x128xf32, #tpu.memory_space<vmem>>, vector<1x1x1x128xf32>
    %429 = vector.shape_cast %428 : vector<1x1x1x128xf32> to vector<1x128xf32>
    %cst_223 = arith.constant 9.99999997E-7 : f32
    %cst_224 = arith.constant 0.999998986 : f32
    %430 = vector.broadcast %cst_223 : f32 to vector<1x128xf32>
    %431 = arith.maximumf %430, %429 : vector<1x128xf32>
    %432 = vector.broadcast %cst_224 : f32 to vector<1x128xf32>
    %433 = arith.minimumf %432, %431 : vector<1x128xf32>
    %434 = arith.index_cast %426 : i32 to index
    %c0_225 = arith.constant 0 : index
    %c0_226 = arith.constant 0 : index
    %c0_227 = arith.constant 0 : index
    %435 = vector.load %arg3[%434, %c0_225, %c0_226, %c0_227] : memref<8x1x1x128xf32, #tpu.memory_space<vmem>>, vector<1x1x1x128xf32>
    %436 = vector.shape_cast %435 : vector<1x1x1x128xf32> to vector<1x128xf32>
    %cst_228 = arith.constant 9.99999997E-7 : f32
    %cst_229 = arith.constant 0.999998986 : f32
    %437 = vector.broadcast %cst_228 : f32 to vector<1x128xf32>
    %438 = arith.maximumf %437, %436 : vector<1x128xf32>
    %439 = vector.broadcast %cst_229 : f32 to vector<1x128xf32>
    %440 = arith.minimumf %439, %438 : vector<1x128xf32>
    %441 = arith.index_cast %426 : i32 to index
    %c0_230 = arith.constant 0 : index
    %c0_231 = arith.constant 0 : index
    %c0_232 = arith.constant 0 : index
    %442 = vector.load %arg4[%441, %c0_230, %c0_231, %c0_232] : memref<8x1x1x128xf32, #tpu.memory_space<vmem>>, vector<1x1x1x128xf32>
    %443 = vector.shape_cast %442 : vector<1x1x1x128xf32> to vector<1x128xf32>
    %cst_233 = arith.constant 9.99999997E-7 : f32
    %cst_234 = arith.constant 0.999998986 : f32
    %444 = vector.broadcast %cst_233 : f32 to vector<1x128xf32>
    %445 = arith.maximumf %444, %443 : vector<1x128xf32>
    %446 = vector.broadcast %cst_234 : f32 to vector<1x128xf32>
    %447 = arith.minimumf %446, %445 : vector<1x128xf32>
    %448 = arith.index_cast %426 : i32 to index
    %c0_235 = arith.constant 0 : index
    %c0_236 = arith.constant 0 : index
    %c0_237 = arith.constant 0 : index
    %449 = vector.load %arg5[%448, %c0_235, %c0_236, %c0_237] : memref<8x1x1x128xf32, #tpu.memory_space<vmem>>, vector<1x1x1x128xf32>
    %450 = vector.shape_cast %449 : vector<1x1x1x128xf32> to vector<1x128xf32>
    %451 = arith.index_cast %426 : i32 to index
    %c0_238 = arith.constant 0 : index
    %c0_239 = arith.constant 0 : index
    %c0_240 = arith.constant 0 : index
    %452 = vector.load %arg8[%451, %c0_238, %c0_239, %c0_240] : memref<8x1x1x128xf32, #tpu.memory_space<vmem>>, vector<1x1x1x128xf32>
    %453 = vector.shape_cast %452 : vector<1x1x1x128xf32> to vector<1x128xf32>
    %454 = vector.shape_cast %425 : vector<1x128xf32> to vector<1x1x1x128xf32>
    tpu.vector_store %arg8[%451, %c0_238, %c0_239, %c0_240], %454 {strides = array<i32>} : memref<8x1x1x128xf32, #tpu.memory_space<vmem>>, vector<1x1x1x128xf32>,
    %cst_241 = arith.constant 1.000000e+00 : f32
    %455 = vector.broadcast %cst_241 : f32 to vector<1x128xf32>
    %456 = arith.subf %455, %425 : vector<1x128xf32>
    %cst_242 = arith.constant 1.000000e+00 : f32
    %457 = vector.broadcast %cst_242 : f32 to vector<1x128xf32>
    %458 = arith.subf %457, %447 : vector<1x128xf32>
    %459 = arith.mulf %425, %458 : vector<1x128xf32>
    %460 = arith.mulf %456, %440 : vector<1x128xf32>
    %461 = arith.addf %459, %460 : vector<1x128xf32>
    %462 = arith.index_cast %426 : i32 to index
    %c0_243 = arith.constant 0 : index
    %c0_244 = arith.constant 0 : index
    %c0_245 = arith.constant 0 : index
    %463 = vector.load %arg7[%462, %c0_243, %c0_244, %c0_245] : memref<8x1x1x128xf32, #tpu.memory_space<vmem>>, vector<1x1x1x128xf32>
    %464 = vector.shape_cast %463 : vector<1x1x1x128xf32> to vector<1x128xf32>
    %465 = vector.shape_cast %461 : vector<1x128xf32> to vector<1x1x1x128xf32>
    tpu.vector_store %arg7[%462, %c0_243, %c0_244, %c0_245], %465 {strides = array<i32>} : memref<8x1x1x128xf32, #tpu.memory_space<vmem>>, vector<1x1x1x128xf32>,
    %466 = tpu.reciprocal %461 {approx = true} : vector<1x128xf32> -> vector<1x128xf32>
    %467 = arith.mulf %459, %466 : vector<1x128xf32>
    %468 = arith.mulf %425, %447 : vector<1x128xf32>
    %cst_246 = arith.constant 1.000000e+00 : f32
    %469 = vector.broadcast %cst_246 : f32 to vector<1x128xf32>
    %470 = arith.subf %469, %440 : vector<1x128xf32>
    %471 = arith.mulf %456, %470 : vector<1x128xf32>
    %472 = arith.addf %468, %471 : vector<1x128xf32>
    %473 = tpu.reciprocal %472 {approx = true} : vector<1x128xf32> -> vector<1x128xf32>
    %474 = arith.mulf %468, %473 : vector<1x128xf32>
    %cst_247 = arith.constant 5.000000e-01 : f32
    %475 = vector.broadcast %cst_247 : f32 to vector<1x128xf32>
    %476 = arith.cmpf ogt, %450, %475 : vector<1x128xf32>
    %477 = arith.select %476, %467, %474 : vector<1x128xi1>, vector<1x128xf32>
    %cst_248 = arith.constant 1.000000e+00 : f32
    %478 = vector.broadcast %cst_248 : f32 to vector<1x128xf32>
    %479 = arith.subf %478, %477 : vector<1x128xf32>
    %480 = arith.mulf %479, %433 : vector<1x128xf32>
    %481 = arith.addf %477, %480 : vector<1x128xf32>
    %cst_249 = arith.constant 9.99999997E-7 : f32
    %cst_250 = arith.constant 0.999998986 : f32
    %482 = vector.broadcast %cst_249 : f32 to vector<1x128xf32>
    %483 = arith.maximumf %482, %481 : vector<1x128xf32>
    %484 = vector.broadcast %cst_250 : f32 to vector<1x128xf32>
    %485 = arith.minimumf %484, %483 : vector<1x128xf32>
    %c1_i32_251 = arith.constant 1 : i32
    %c0_252 = arith.constant 0 : index
    %c0_253 = arith.constant 0 : index
    %486 = vector.load %arg9[%c0_252, %c0_253] : memref<1x128xf32, #tpu.memory_space<vmem>>, vector<1x128xf32>
    tpu.vector_store %arg9[%c0_252, %c0_253], %485 {strides = array<i32>} : memref<1x128xf32, #tpu.memory_space<vmem>>, vector<1x128xf32>,
    return
  }
  func.func @transform_0(%arg0: i32, %arg1: i32) -> (i32, i32, i32, i32) {
    %c0_i32 = arith.constant 0 : i32
    %c0_i32_0 = arith.constant 0 : i32
    %c0_i32_1 = arith.constant 0 : i32
    return %arg1, %arg0, %c0_i32, %c0_i32_0 : i32, i32, i32, i32
  }
  func.func @transform_1(%arg0: i32, %arg1: i32) -> (i32, i32, i32, i32) {
    %c0_i32 = arith.constant 0 : i32
    %c0_i32_0 = arith.constant 0 : i32
    %c0_i32_1 = arith.constant 0 : i32
    return %arg1, %arg0, %c0_i32, %c0_i32_0 : i32, i32, i32, i32
  }
  func.func @transform_2(%arg0: i32, %arg1: i32) -> (i32, i32, i32, i32) {
    %c0_i32 = arith.constant 0 : i32
    %c0_i32_0 = arith.constant 0 : i32
    %c0_i32_1 = arith.constant 0 : i32
    return %arg1, %arg0, %c0_i32, %c0_i32_0 : i32, i32, i32, i32
  }
  func.func @transform_3(%arg0: i32, %arg1: i32) -> (i32, i32, i32, i32) {
    %c0_i32 = arith.constant 0 : i32
    %c0_i32_0 = arith.constant 0 : i32
    %c0_i32_1 = arith.constant 0 : i32
    return %arg1, %arg0, %c0_i32, %c0_i32_0 : i32, i32, i32, i32
  }
  func.func @transform_4(%arg0: i32, %arg1: i32) -> (i32, i32, i32) {
    %c0_i32 = arith.constant 0 : i32
    %c0_i32_0 = arith.constant 0 : i32
    %c0_i32_1 = arith.constant 0 : i32
    return %arg0, %c0_i32, %c0_i32_0 : i32, i32, i32
  }
  func.func @transform_5(%arg0: i32, %arg1: i32) -> (i32, i32, i32, i32) {
    %c0_i32 = arith.constant 0 : i32
    %c0_i32_0 = arith.constant 0 : i32
    %c0_i32_1 = arith.constant 0 : i32
    return %arg1, %arg0, %c0_i32, %c0_i32_0 : i32, i32, i32, i32
  }
  func.func @transform_6(%arg0: i32, %arg1: i32) -> (i32, i32, i32, i32) {
    %c0_i32 = arith.constant 0 : i32
    %c0_i32_0 = arith.constant 0 : i32
    %c0_i32_1 = arith.constant 0 : i32
    return %arg1, %arg0, %c0_i32, %c0_i32_0 : i32, i32, i32, i32
  }
}

</mosaic_0001>

<bundles_post_ra>
// kernel: bktnn_forward.3
= control target key start
LH: loop header
LB: loop body
LE: loop exit
PB: predicated region body
PF: predicated region fallthrough
CT: control target
= control target key end

     0   :  { %s1197_s21 = smov 0   ;;  %s1199_s22 = smov 0   ;;  %s1300_s0 = inlined_call_operand.vmem [shape: f32[16,32], index: 0, kind: input, shape index: {}]   ;;  %s1301_s1 = inlined_call_operand.vmem [shape: f32[16,32], index: 1, kind: input, shape index: {}]   ;;  %s1302_s2 = inlined_call_operand.vmem [shape: f32[2,32,32], index: 2, kind: input, shape index: {}]   ;;  %s1303_s3 = inlined_call_operand.vmem [shape: f32[2,1,32], index: 3, kind: input, shape index: {}]   ;;  %s1304_s4 = inlined_call_operand.vmem [shape: f32[2,32,32], index: 4, kind: input, shape index: {}]   ;;  %s1305_s5 = inlined_call_operand.vmem [shape: f32[2,1,32], index: 5, kind: input, shape index: {}]   ;;  %s1306_s6 = inlined_call_operand.vmem [shape: f32[2,32,32], index: 6, kind: input, shape index: {}]   ;;  %s1307_s7 = inlined_call_operand.vmem [shape: f32[2,1,32], index: 7, kind: input, shape index: {}]   ;;  %s1308_s8 = inlined_call_operand.vmem [shape: f32[2,32,32], index: 8, kind: input, shape index: {}]   ;;  %s1309_s9 = inlined_call_operand.vmem [shape: f32[2,1,32], index: 9, kind: input, shape index: {}]   ;;  %s1310_s10 = inlined_call_operand.vmem [shape: f32[2,32,128], index: 10, kind: input, shape index: {}]   ;;  %s1311_s11 = inlined_call_operand.vmem [shape: f32[2,1,128], index: 11, kind: input, shape index: {}]   ;;  %s1312_s12 = inlined_call_operand.vmem [shape: f32[2,16,128], index: 12, kind: output, shape index: {}]  }
   0x1   :  { %s1201_s23 = smov 0  }
   0x2 LB: > { %s34_s24 = sadd.s32 1, %s1126_s22  ;;  %p1043_p0 = scmp.ge.s32.totalorder %s1130_s23, 1  ;;  %s1130_s23 = sphi %s1201_s23, %s22_s23   ;;  %s1126_s22 = sphi %s1199_s22, %s1314_s22   ;;  %s1122_s21 = sphi %s1197_s21, %s1313_s21  }
   0x3   : > { %p36_p1 = scmp.ge.s32.totalorder %s34_s24, 2  ;;  %p478_p2 = scmp.lt.s32.totalorder %s1130_s23, 3 }
   0x5   : > { %s1316_s24 = smov (%p36_p1, %s34_s24), 0  ;;  %p479_p3 = pnand %p1043_p0, %p478_p2 }
   0x6   : > { %p581_p4 = scmp.lt.s32.totalorder (!%p479_p3), %s1122_s21, 1  ;;  %p632_p5 = scmp.eq.s32.totalorder (!%p479_p3), %s1122_s21, 1 }
   0x7   : > { %482 = sbr.rel (%p479_p3) target bundleno = 763 (0x2fb), region = 68 }
   0xc   : > { %s1318_s21 = smov (!%p581_p4, %s1122_s21), 1  ;;  %v637_v0 = vld [vmem:[%s1301_s1] sm:$0xff]  ;;  %v638_v1 = vld [vmem:[%s1301_s1 + $0x8] sm:$0xff]  ;;  %vm655_vm0 = vcmask 261120  }
   0xd   : > { %s633_s25 = scalar_select %p632_p5, 1, 0  ;;  %v635_v7 = vld [vmem:[%s1300_s0] sm:$0xff]  ;;  %v636_v8 = vld [vmem:[%s1300_s0 + $0x8] sm:$0xff] }
   0xe   : > { %s1218_s26 = sshll.u32 %s1318_s21, 5  ;;  %s588_s29 = scalar_lea.vmem %s1303_s3, %s1318_s21 }
   0xf   : > { %s585_s14 = scalar_lea.vmem %s1302_s2, %s1218_s26  ;;  %s634_s15 = scvt.s32.f32 %s633_s25  ;;  %v1095_v23 = vld [vmem:[%s588_s29] ss:$0 sm:$0xff] }
  0x10   : > { %v646_v2 = vld [vmem:[%s585_s14 + $0x10] sm:$0xff]  ;;  %v647_v3 = vld [vmem:[%s585_s14 + $0x18] sm:$0xff]  ;;  %v644_v4 = vld [vmem:[%s585_s14] sm:$0xff]  ;;  %s604_s25 = scalar_lea.vmem %s1307_s7, %s1318_s21  ;;  %s601_s13 = scalar_lea.vmem %s1306_s6, %s1218_s26 }
  0x11   : > { %v651_v5 = vpack.c.bf16 %v647_v3, %v646_v2  ;;  %v645_v6 = vld [vmem:[%s585_s14 + $0x8] sm:$0xff]  ;;  %v639_v9 = vstv %s634_s15  ;;  %s596_s14 = scalar_lea.vmem %s1305_s5, %s1318_s21  ;;  %s593_s15 = scalar_lea.vmem %s1304_s4, %s1218_s26  ;;  %v707_v30 = vld [vmem:[%s601_s13 + $0x10] sm:$0xff]  ;;  %v708_v31 = vld [vmem:[%s601_s13 + $0x18] sm:$0xff] }
  0x12   : > { %v640_v10 = vmul.f32 %v639_v9, %v637_v0  ;;  %v641_v11 = vmul.f32 %v639_v9, %v638_v1  ;;  %v650_v12 = vpack.c.bf16 %v645_v6, %v644_v4  ;;  %v677_v16 = vld [vmem:[%s593_s15 + $0x10] sm:$0xff]  ;;  %v678_v17 = vld [vmem:[%s593_s15 + $0x18] sm:$0xff]  ;;  %v675_v19 = vld [vmem:[%s593_s15] sm:$0xff]  ;;  %v712_v32 = vpack.c.bf16 %v708_v31, %v707_v30  ;;  %s612_s17 = scalar_lea.vmem %s1309_s9, %s1318_s21  ;;  %s609_s19 = scalar_lea.vmem %s1308_s8, %s1218_s26 }
  0x13   : > { %665 = vmatpush.bf16.msra.mxu0 %v651_v5  ;;  %v682_v18 = vpack.c.bf16 %v678_v17, %v677_v16  ;;  %v676_v20 = vld [vmem:[%s593_s15 + $0x8] sm:$0xff]  ;;  %v705_v33 = vld [vmem:[%s601_s13] sm:$0xff]  ;;  %v737_v44 = vld [vmem:[%s609_s19 + $0x10] sm:$0xff]  ;;  %s617_s27 = scalar_lea.vmem %s1310_s10, %s1218_s26  ;;  %s620_s29 = scalar_lea.vmem %s1311_s11, %s1318_s21 }
  0x14   : > { %v642_v13 = vadd.f32 %v640_v10, %v635_v7  ;;  %v643_v14 = vadd.f32 %v641_v11, %v636_v8  ;;  %v681_v21 = vpack.c.bf16 %v676_v20, %v675_v19  ;;  %725 = vmatpush.bf16.msra.mxu2 %v712_v32  ;;  %v706_v34 = vld [vmem:[%s601_s13 + $0x8] sm:$0xff]  ;;  %v1096_v37 = vld [vmem:[%s596_s14] ss:$0 sm:$0xff]  ;;  %v738_v45 = vld [vmem:[%s609_s19 + $0x18] sm:$0xff] }
  0x15   : > { %695 = vmatpush.bf16.msra.mxu1 %v682_v18  ;;  %v711_v35 = vpack.c.bf16 %v706_v34, %v705_v33  ;;  %v742_v46 = vpack.c.bf16 %v738_v45, %v737_v44  ;;  %v735_v47 = vld [vmem:[%s609_s19] sm:$0xff]  ;;  %v736_v48 = vld [vmem:[%s609_s19 + $0x8] sm:$0xff]  ;;  %v767_v50 = vld [vmem:[%s617_s27 + $0x10] sm:$0xff] }
  0x16   : > { %v649_v15 = vpack.c.bf16 %v643_v14, %v642_v13  ;;  %v741_v49 = vpack.c.bf16 %v736_v48, %v735_v47  ;;  %v768_v51 = vld [vmem:[%s617_s27 + $0x18] sm:$0xff]  ;;  %v1097_v54 = vld [vmem:[%s604_s25] ss:$0 sm:$0xff]  ;;  %v766_v62 = vld [vmem:[%s617_s27 + $0x8] sm:$0xff]  ;;  %s1070_s25 = sshll.u32 %s1318_s21, 4 }
  0x17   : > { %666 = vmatpush.bf16.msra.mxu0 %v650_v12  ;;  %755 = vmatpush.bf16.msra.mxu3 %v742_v46  ;;  %v772_v52 = vpack.c.bf16 %v768_v51, %v767_v50  ;;  %v765_v61 = vld [vmem:[%s617_s27] sm:$0xff]  ;;  %s629_s15 = scalar_lea.vmem %s1312_s12, %s1070_s25 }
  0x18   : > { %726 = vmatpush.bf16.msra.mxu2 %v711_v35  ;;  %v771_v63 = vpack.c.bf16 %v766_v62, %v765_v61  ;;  %v1098_v1 = vld [vmem:[%s612_s17] ss:$0 sm:$0xff] }
  0x19   : > { %696 = vmatpush.bf16.msra.mxu1 %v681_v21  ;;  %v1099_v8 = vld [vmem:[%s620_s29] ss:$0 sm:$0xff] }
  0x1a   : > { %1056 = vmatmul.msk.bf16.vlgmr.msra.gmra.mxu0 %vm655_vm0, %v649_v15 }
  0x1b   : > { %756 = vmatpush.bf16.msra.mxu3 %v741_v49  ;;  %785 = vmatpush.bf16.msrb.mxu0 %v772_v52 }
  0x1f   : > { %786 = vmatpush.bf16.msrb.mxu0 %v771_v63 }
  0x97   : > { %v668_v22 = vpop.f32.mrf.mxu0 }
  0x98   : > { %v669_v24 = vadd.f32 %v1095_v23, %v668_v22 }
  0x9a   : > { %v673_v27 = vmax.f32 %v669_v24, 0.0 }
  0x9f   : > { %v670_v25 = vpop.f32.mrf.mxu0 }
  0xa0   : > { %v671_v26 = vadd.f32 %v1095_v23, %v670_v25 }
  0xa2   : > { %v674_v28 = vmax.f32 %v671_v26, 0.0 }
  0xa4   : > { %v680_v29 = vpack.c.bf16 %v674_v28, %v673_v27 }
  0xa6   : > { %1057 = vmatmul.msk.bf16.vlgmr.msra.gmra.mxu1 %vm655_vm0, %v680_v29 }
 0x123   : > { %v698_v36 = vpop.f32.mrf.mxu1 }
 0x124   : > { %v699_v38 = vadd.f32 %v1096_v37, %v698_v36 }
 0x126   : > { %v703_v41 = vmax.f32 %v699_v38, 0.0 }
 0x12b   : > { %v700_v39 = vpop.f32.mrf.mxu1 }
 0x12c   : > { %v701_v40 = vadd.f32 %v1096_v37, %v700_v39 }
 0x12e   : > { %v704_v42 = vmax.f32 %v701_v40, 0.0 }
 0x130   : > { %v710_v43 = vpack.c.bf16 %v704_v42, %v703_v41 }
 0x132   : > { %1058 = vmatmul.msk.bf16.vlgmr.msra.gmra.mxu2 %vm655_vm0, %v710_v43 }
 0x1b5   : > { %v728_v53 = vpop.f32.mrf.mxu2 }
 0x1b6   : > { %v729_v55 = vadd.f32 %v1097_v54, %v728_v53 }
 0x1b8   : > { %v733_v58 = vmax.f32 %v729_v55, 0.0 }
 0x1bd   : > { %v730_v56 = vpop.f32.mrf.mxu2 }
 0x1be   : > { %v731_v57 = vadd.f32 %v1097_v54, %v730_v56 }
 0x1c0   : > { %v734_v59 = vmax.f32 %v731_v57, 0.0 }
 0x1c2   : > { %v740_v60 = vpack.c.bf16 %v734_v59, %v733_v58 }
 0x1c4   : > { %1059 = vmatmul.msk.bf16.vlgmr.msra.gmra.mxu3 %vm655_vm0, %v740_v60 }
 0x247   : > { %v758_v0 = vpop.f32.mrf.mxu3 }
 0x248   : > { %v759_v2 = vadd.f32 %v1098_v1, %v758_v0 }
 0x24a   : > { %v763_v5 = vmax.f32 %v759_v2, 0.0 }
 0x24f   : > { %v760_v3 = vpop.f32.mrf.mxu3 }
 0x250   : > { %v761_v4 = vadd.f32 %v1098_v1, %v760_v3 }
 0x252   : > { %v764_v6 = vmax.f32 %v761_v4, 0.0 }
 0x254   : > { %v770_v7 = vpack.c.bf16 %v764_v6, %v763_v5 }
 0x256   : > { %1060 = vmatmul.msk.bf16.vlgmr.msrb.gmra.mxu0 %vm655_vm0, %v770_v7 }
 0x2d3   : > { %v788_v9 = vpop.f32.mrf.mxu0 }
 0x2d4   : > { %v789_v10 = vadd.f32 %v1099_v8, %v788_v9 }
 0x2d6   : > { %v1061_v11 = vmul.f32 -1.442695, %v789_v10 }
 0x2d8   : > { %1100 = vpow2.f32 %v1061_v11 }
 0x2db   : > { %v790_v12 = vpop.f32.mrf.mxu0 }
 0x2dc   : > { %v791_v13 = vadd.f32 %v1099_v8, %v790_v12 }
 0x2de   : > { %v1101_v14 = vpop.eup %1100  ;;  %v1062_v15 = vmul.f32 -1.442695, %v791_v13 }
 0x2df   : > { %v799_v16 = vadd.f32 1.0, %v1101_v14 }
 0x2e0   : > { %1102 = vpow2.f32 %v1062_v15 }
 0x2e1   : > { %1104 = vrcp.f32 %v799_v16  ;;  %v812_v22 = vand.u32 2147483648, %v799_v16  ;;  %v810_v24 = vand.u32 2147483647, %v799_v16  ;;  %vm806_vm2 = vweird.f32 %v799_v16 }
 0x2e3   : > { %v813_v27 = vor.u32 1.1754944e-38, %v812_v22  ;;  %vm811_vm4 = vcmp.eq.f32.partialorder %v810_v24, 8.507059e+37 }
 0x2e6   : > { %v1103_v17 = vpop.eup %1102 }
 0x2e7   : > { %v1105_v18 = vpop.eup %1104  ;;  %v800_v19 = vadd.f32 1.0, %v1103_v17 }
 0x2e8   : > { %v802_v20 = vmul.f32 %v1105_v18, %v799_v16  ;;  %vm807_vm1 = vweird.f32 %v1105_v18 }
 0x2e9   : > { %1106 = vrcp.f32 %v800_v19  ;;  %vm808_vm3 = vmor %vm806_vm2, %vm807_vm1  ;;  %v827_v32 = vand.u32 2147483648, %v800_v19  ;;  %v825_v34 = vand.u32 2147483647, %v800_v19  ;;  %vm821_vm6 = vweird.f32 %v800_v19 }
 0x2ea   : > { %v803_v21 = vsub.f32 1.0, %v802_v20 }
 0x2eb   : > { %v828_v36 = vor.u32 1.1754944e-38, %v827_v32  ;;  %vm826_vm8 = vcmp.eq.f32.partialorder %v825_v34, 8.507059e+37 }
 0x2ec   : > { %v804_v23 = vmul.f32 %v1105_v18, %v803_v21 }
 0x2ee   : > { %v805_v25 = vadd.f32 %v1105_v18, %v804_v23 }
 0x2ef   : > { %v1107_v26 = vpop.eup %1106 }
 0x2f0   : > { %v809_v28 = vsel %vm808_vm3, %v1105_v18, %v805_v25  ;;  %v817_v29 = vmul.f32 %v1107_v26, %v800_v19  ;;  %vm822_vm5 = vweird.f32 %v1107_v26 }
 0x2f1   : > { %v814_v30 = vsel %vm811_vm4, %v813_v27, %v809_v28  ;;  %vm823_vm7 = vmor %vm821_vm6, %vm822_vm5 }
 0x2f2   : > { %831 = vst [vmem:[%s629_s15] sm:$0xff] %v814_v30  ;;  %v818_v31 = vsub.f32 1.0, %v817_v29 }
 0x2f4   : > { %v819_v33 = vmul.f32 %v1107_v26, %v818_v31 }
 0x2f6   : > { %v820_v35 = vadd.f32 %v1107_v26, %v819_v33 }
 0x2f8   : > { %v824_v37 = vsel %vm823_vm7, %v1107_v26, %v820_v35 }
 0x2f9   : > { %v829_v38 = vsel %vm826_vm8, %v828_v36, %v824_v37 }
 0x2fa   : > { %832 = vst [vmem:[%s629_s15 + $0x8] sm:$0xff] %v829_v38 }
 0x2fb PF: > { %s22_s23 = sadd.s32 1, %s1130_s23   ;;  %s1313_s21 = smov %s1126_s22 }
 0x2fc   : > { %p19_p6 = scmp.ge.s32.totalorder %s22_s23, 4   ;;  %s1314_s22 = smov %s1316_s24 }
 0x2fe   :  { %21 = sbr.rel (!%p19_p6) target bundleno = 2 (0x2), region = 131 }

// kernel: bktnn_forward.4
= control target key start
LH: loop header
LB: loop body
LE: loop exit
PB: predicated region body
PF: predicated region fallthrough
CT: control target
= control target key end

     0   :  { %vm45_vm0 = vcmask 261120   ;;  %s303_s1 = inlined_call_operand.vmem [shape: f32[1,32,32], index: 1, kind: input, shape index: {}]   ;;  %s304_s0 = inlined_call_operand.vmem [shape: f32[8,32], index: 0, kind: input, shape index: {}]   ;;  %s305_s2 = inlined_call_operand.vmem [shape: f32[1,1,32], index: 2, kind: input, shape index: {}]   ;;  %s306_s4 = inlined_call_operand.vmem [shape: f32[1,1,32], index: 4, kind: input, shape index: {}]   ;;  %s307_s3 = inlined_call_operand.vmem [shape: f32[1,32,32], index: 3, kind: input, shape index: {}]   ;;  %s308_s6 = inlined_call_operand.vmem [shape: f32[1,1,32], index: 6, kind: input, shape index: {}]   ;;  %s309_s5 = inlined_call_operand.vmem [shape: f32[1,32,32], index: 5, kind: input, shape index: {}]   ;;  %s310_s8 = inlined_call_operand.vmem [shape: f32[1,1,128], index: 8, kind: input, shape index: {}]   ;;  %s311_s7 = inlined_call_operand.vmem [shape: f32[1,32,128], index: 7, kind: input, shape index: {}]   ;;  %s312_s9 = inlined_call_operand.vmem [shape: f32[1,8,128], index: 9, kind: output, shape index: {}]  }
   0x1   :  { %v36_v0 = vld [vmem:[%s303_s1 + $0x10] sm:$0xff]  ;;  %v37_v1 = vld [vmem:[%s303_s1 + $0x18] sm:$0xff]  ;;  %v34_v2 = vld [vmem:[%s303_s1] sm:$0xff] }
   0x2   :  { %v41_v3 = vpack.c.bf16 %v37_v1, %v36_v0  ;;  %v35_v4 = vld [vmem:[%s303_s1 + $0x8] sm:$0xff]  ;;  %v33_v6 = vld [vmem:[%s304_s0] sm:$0xff]  ;;  %v65_v8 = vld [vmem:[%s307_s3 + $0x10] sm:$0xff] }
   0x3   :  { %v40_v5 = vpack.c.bf16 %v35_v4, %v34_v2  ;;  %v39_v7 = vpack.c.bf16 %v33_v6, %v33_v6  ;;  %v66_v9 = vld [vmem:[%s307_s3 + $0x18] sm:$0xff]  ;;  %v63_v11 = vld [vmem:[%s307_s3] sm:$0xff]  ;;  %v64_v12 = vld [vmem:[%s307_s3 + $0x8] sm:$0xff] }
   0x4   :  { %55 = vmatpush.bf16.msra.mxu0 %v41_v3  ;;  %v70_v10 = vpack.c.bf16 %v66_v9, %v65_v8  ;;  %v69_v13 = vpack.c.bf16 %v64_v12, %v63_v11  ;;  %v175_v14 = vld [vmem:[%s305_s2] ss:$0 sm:$0xff]  ;;  %v93_v20 = vld [vmem:[%s309_s5 + $0x10] sm:$0xff]  ;;  %v94_v21 = vld [vmem:[%s309_s5 + $0x18] sm:$0xff] }
   0x5   :  { %v98_v22 = vpack.c.bf16 %v94_v21, %v93_v20  ;;  %v91_v23 = vld [vmem:[%s309_s5] sm:$0xff]  ;;  %v92_v24 = vld [vmem:[%s309_s5 + $0x8] sm:$0xff]  ;;  %v121_v32 = vld [vmem:[%s311_s7 + $0x10] sm:$0xff] }
   0x6   :  { %83 = vmatpush.bf16.msra.mxu1 %v70_v10  ;;  %v97_v25 = vpack.c.bf16 %v92_v24, %v91_v23  ;;  %v176_v26 = vld [vmem:[%s306_s4] ss:$0 sm:$0xff]  ;;  %v122_v33 = vld [vmem:[%s311_s7 + $0x18] sm:$0xff]  ;;  %v120_v36 = vld [vmem:[%s311_s7 + $0x8] sm:$0xff] }
   0x7   :  { %111 = vmatpush.bf16.msra.mxu2 %v98_v22  ;;  %v126_v34 = vpack.c.bf16 %v122_v33, %v121_v32  ;;  %v119_v35 = vld [vmem:[%s311_s7] sm:$0xff] }
   0x8   :  { %56 = vmatpush.bf16.msra.mxu0 %v40_v5  ;;  %v125_v37 = vpack.c.bf16 %v120_v36, %v119_v35  ;;  %v177_v38 = vld [vmem:[%s308_s6] ss:$0 sm:$0xff] }
   0x9   :  { %139 = vmatpush.bf16.msra.mxu3 %v126_v34  ;;  %v178_v44 = vld [vmem:[%s310_s8] ss:$0 sm:$0xff] }
   0xa   :  { %84 = vmatpush.bf16.msra.mxu1 %v69_v13 }
   0xb   :  { %170 = vmatmul.msk.bf16.vlgmr.msra.gmra.mxu0 %vm45_vm0, %v39_v7  ;;  %112 = vmatpush.bf16.msra.mxu2 %v97_v25 }
   0xd   :  { %140 = vmatpush.bf16.msra.mxu3 %v125_v37 }
  0x88   :  { %v58_v15 = vpop.f32.mrf.mxu0 }
  0x89   :  { %v59_v16 = vadd.f32 %v175_v14, %v58_v15 }
  0x8b   :  { %v62_v17 = vmax.f32 %v59_v16, 0.0 }
  0x8d   :  { %v68_v18 = vpack.c.bf16 %v62_v17, %v62_v17 }
  0x8f   :  { %171 = vmatmul.msk.bf16.vlgmr.msra.gmra.mxu1 %vm45_vm0, %v68_v18 }
  0x90   :  { %v60_v19 = vpop.f32.mrf.mxu0 }
 0x10c   :  { %v86_v27 = vpop.f32.mrf.mxu1 }
 0x10d   :  { %v87_v28 = vadd.f32 %v176_v26, %v86_v27 }
 0x10f   :  { %v90_v29 = vmax.f32 %v87_v28, 0.0 }
 0x111   :  { %v96_v30 = vpack.c.bf16 %v90_v29, %v90_v29 }
 0x113   :  { %172 = vmatmul.msk.bf16.vlgmr.msra.gmra.mxu2 %vm45_vm0, %v96_v30 }
 0x114   :  { %v88_v31 = vpop.f32.mrf.mxu1 }
 0x196   :  { %v114_v39 = vpop.f32.mrf.mxu2 }
 0x197   :  { %v115_v40 = vadd.f32 %v177_v38, %v114_v39 }
 0x199   :  { %v118_v41 = vmax.f32 %v115_v40, 0.0 }
 0x19b   :  { %v124_v42 = vpack.c.bf16 %v118_v41, %v118_v41 }
 0x19d   :  { %173 = vmatmul.msk.bf16.vlgmr.msra.gmra.mxu3 %vm45_vm0, %v124_v42 }
 0x19e   :  { %v116_v43 = vpop.f32.mrf.mxu2 }
 0x220   :  { %v142_v45 = vpop.f32.mrf.mxu3 }
 0x221   :  { %v143_v46 = vadd.f32 %v178_v44, %v142_v45 }
 0x223   :  { %v174_v47 = vmul.f32 -1.442695, %v143_v46 }
 0x225   :  { %179 = vpow2.f32 %v174_v47 }
 0x228   :  { %v144_v48 = vpop.f32.mrf.mxu3 }
 0x22b   :  { %v180_v49 = vpop.eup %179 }
 0x22c   :  { %v149_v50 = vadd.f32 1.0, %v180_v49 }
 0x22e   :  { %181 = vrcp.f32 %v149_v50  ;;  %v161_v54 = vand.u32 2147483648, %v149_v50  ;;  %v159_v56 = vand.u32 2147483647, %v149_v50  ;;  %vm155_vm2 = vweird.f32 %v149_v50 }
 0x230   :  { %v162_v58 = vor.u32 1.1754944e-38, %v161_v54  ;;  %vm160_vm4 = vcmp.eq.f32.partialorder %v159_v56, 8.507059e+37 }
 0x234   :  { %v182_v51 = vpop.eup %181 }
 0x235   :  { %v151_v52 = vmul.f32 %v182_v51, %v149_v50  ;;  %vm156_vm1 = vweird.f32 %v182_v51 }
 0x236   :  { %vm157_vm3 = vmor %vm155_vm2, %vm156_vm1 }
 0x237   :  { %v152_v53 = vsub.f32 1.0, %v151_v52 }
 0x239   :  { %v153_v55 = vmul.f32 %v182_v51, %v152_v53 }
 0x23b   :  { %v154_v57 = vadd.f32 %v182_v51, %v153_v55 }
 0x23d   :  { %v158_v59 = vsel %vm157_vm3, %v182_v51, %v154_v57 }
 0x23e   :  { %v163_v60 = vsel %vm160_vm4, %v162_v58, %v158_v59 }
 0x23f   :  { %165 = vst [vmem:[%s312_s9] sm:$0xff] %v163_v60 }

// kernel: bktnn_forward.5
= control target key start
LH: loop header
LB: loop body
LE: loop exit
PB: predicated region body
PF: predicated region fallthrough
CT: control target
= control target key end

     0   :  { %s641_s4 = inlined_call_operand.vmem [shape: f32[1,1,128], index: 4, kind: input, shape index: {}]   ;;  %s642_s1 = inlined_call_operand.vmem [shape: f32[8,1,1,128], index: 1, kind: input, shape index: {}]   ;;  %s643_s2 = inlined_call_operand.vmem [shape: f32[8,1,1,128], index: 2, kind: input, shape index: {}]   ;;  %s644_s6 = inlined_call_operand.vmem [shape: f32[8,1,1,128], index: 6, kind: output, shape index: {1}]   ;;  %s645_s5 = inlined_call_operand.vmem [shape: f32[8,1,1,128], index: 5, kind: output, shape index: {0}]   ;;  %s646_s0 = inlined_call_operand.vmem [shape: f32[8,1,1,128], index: 0, kind: input, shape index: {}]   ;;  %s647_s3 = inlined_call_operand.vmem [shape: f32[8,1,1,128], index: 3, kind: input, shape index: {}]  }
   0x1   :  { %v26_v0 = vld [vmem:[%s641_s4] sm:$0x1]  ;;  %v386_v24 = vld [vmem:[%s642_s1 + $0x1] sm:$0x1]  ;;  %v392_v53 = vld [vmem:[%s642_s1 + $0x2] sm:$0x1] }
   0x2   :  { %v32_v1 = vld [vmem:[%s642_s1] sm:$0x1]  ;;  %27 = vst [vmem:[#allocation2] sm:$0x1] %v26_v0  ;;  %v387_v25 = vld [vmem:[%s643_s2 + $0x1] sm:$0x1] }
   0x3   :  { %v35_v2 = vld [vmem:[%s643_s2] sm:$0x1]  ;;  %v33_v3 = vmax.f32 %v32_v1, 1e-06  ;;  %v68_v29 = vmax.f32 %v386_v24, 1e-06 }
   0x4   :  { %v36_v4 = vmax.f32 %v35_v2, 1e-06  ;;  %v29_v17 = vld [vmem:[%s646_s0] sm:$0x1]  ;;  %v72_v30 = vmax.f32 %v387_v25, 1e-06 }
   0x5   :  { %v34_v5 = vmin.f32 %v33_v3, 0.999999  ;;  %v38_v18 = vld [vmem:[%s647_s3] sm:$0x1]  ;;  %v30_v19 = vmax.f32 %v29_v17, 1e-06 }
   0x6   :  { %v37_v6 = vmin.f32 %v36_v4, 0.999999  ;;  %vm54_vm0 = vcmp.gt.f32.partialorder %v38_v18, 0.5  ;;  %v69_v33 = vmin.f32 %v68_v29, 0.999999 }
   0x7   :  { %v49_v8 = vsub.f32 1.0, %v34_v5  ;;  %v31_v26 = vmin.f32 %v30_v19, 0.999999  ;;  %v73_v34 = vmin.f32 %v72_v30, 0.999999 }
   0x8   :  { %v41_v7 = vsub.f32 1.0, %v37_v6  ;;  %v88_v38 = vsub.f32 1.0, %v69_v33  ;;  %v385_v46 = vld [vmem:[%s646_s0 + $0x1] sm:$0x1]  ;;  %v393_v54 = vld [vmem:[%s643_s2 + $0x2] sm:$0x1] }
   0x9   :  { %v28_v9 = vld [vmem:[#allocation2] sm:$0x1]  ;;  %v79_v37 = vsub.f32 1.0, %v73_v34  ;;  %v388_v47 = vld [vmem:[%s647_s3 + $0x1] sm:$0x1] }
   0xa   :  { %39 = vst [vmem:[%s644_s6] sm:$0x1] %v28_v9  ;;  %v40_v10 = vsub.f32 1.0, %v28_v9  ;;  %v42_v11 = vmul.f32 %v41_v7, %v28_v9  ;;  %v48_v13 = vmul.f32 %v37_v6, %v28_v9  ;;  %v64_v48 = vmax.f32 %v385_v46, 1e-06  ;;  %v398_v18 = vld [vmem:[%s642_s1 + $0x3] sm:$0x1] }
   0xb   :  { %vm93_vm1 = vcmp.gt.f32.partialorder %v388_v47, 0.5  ;;  %v107_v58 = vmax.f32 %v392_v53, 1e-06  ;;  %v111_v59 = vmax.f32 %v393_v54, 1e-06 }
   0xc   :  { %v43_v12 = vmul.f32 %v40_v10, %v34_v5  ;;  %v50_v14 = vmul.f32 %v49_v8, %v40_v10  ;;  %v65_v55 = vmin.f32 %v64_v48, 0.999999  ;;  %v399_v19 = vld [vmem:[%s643_s2 + $0x3] sm:$0x1]  ;;  %v404_v47 = vld [vmem:[%s642_s1 + $0x4] sm:$0x1] }
   0xd   :  { %v108_v62 = vmin.f32 %v107_v58, 0.999999  ;;  %v112_v63 = vmin.f32 %v111_v59, 0.999999  ;;  %v150_v24 = vmax.f32 %v399_v19, 1e-06 }
   0xe   :  { %v44_v15 = vadd.f32 %v43_v12, %v42_v11  ;;  %v51_v16 = vadd.f32 %v50_v14, %v48_v13  ;;  %v394_v12 = vld [vmem:[%s647_s3 + $0x2] sm:$0x1]  ;;  %v405_v48 = vld [vmem:[%s643_s2 + $0x4] sm:$0x1] }
   0xf   :  { %v118_v2 = vsub.f32 1.0, %v112_v63  ;;  %v127_v3 = vsub.f32 1.0, %v108_v62  ;;  %vm132_vm2 = vcmp.gt.f32.partialorder %v394_v12, 0.5  ;;  %v189_v53 = vmax.f32 %v405_v48, 1e-06 }
  0x10   :  { %45 = vst [vmem:[%s645_s5] sm:$0x1] %v44_v15  ;;  %427 = vrcp.f32 %v44_v15  ;;  %v410_v12 = vld [vmem:[%s642_s1 + $0x5] sm:$0x1] }
  0x11   :  { %429 = vrcp.f32 %v51_v16 }
  0x16   :  { %v428_v20 = vpop.eup %427 }
  0x17   :  { %v430_v21 = vpop.eup %429  ;;  %v47_v22 = vmul.f32 %v428_v20, %v42_v11  ;;  %v391_v11 = vld [vmem:[%s646_s0 + $0x2] sm:$0x1] }
  0x18   :  { %v53_v23 = vmul.f32 %v430_v21, %v48_v13  ;;  %v103_v13 = vmax.f32 %v391_v11, 1e-06 }
  0x1a   :  { %v55_v27 = vsel %vm54_vm0, %v47_v22, %v53_v23  ;;  %v104_v20 = vmin.f32 %v103_v13, 0.999999  ;;  %v146_v23 = vmax.f32 %v398_v18, 1e-06  ;;  %v411_v13 = vld [vmem:[%s643_s2 + $0x5] sm:$0x1] }
  0x1b   :  { %v56_v28 = vsub.f32 1.0, %v55_v27  ;;  %v228_v18 = vmax.f32 %v411_v13, 1e-06 }
  0x1d   :  { %v57_v31 = vmul.f32 %v56_v28, %v31_v26  ;;  %v151_v28 = vmin.f32 %v150_v24, 0.999999 }
  0x1f   :  { %v58_v32 = vadd.f32 %v57_v31, %v55_v27  ;;  %v147_v27 = vmin.f32 %v146_v23, 0.999999  ;;  %v157_v31 = vsub.f32 1.0, %v151_v28 }
  0x21   :  { %v59_v35 = vmax.f32 %v58_v32, 1e-06  ;;  %v166_v32 = vsub.f32 1.0, %v147_v27 }
  0x23   :  { %v60_v36 = vmin.f32 %v59_v35, 0.999999 }
  0x25   :  { %389 = vst [vmem:[%s644_s6 + $0x1] sm:$0x1] %v60_v36  ;;  %v78_v39 = vsub.f32 1.0, %v60_v36  ;;  %v80_v40 = vmul.f32 %v79_v37, %v60_v36  ;;  %v87_v42 = vmul.f32 %v73_v34, %v60_v36 }
  0x27   :  { %v81_v41 = vmul.f32 %v78_v39, %v69_v33  ;;  %v89_v43 = vmul.f32 %v88_v38, %v78_v39 }
  0x29   :  { %v82_v44 = vadd.f32 %v81_v41, %v80_v40  ;;  %v90_v45 = vadd.f32 %v89_v43, %v87_v42  ;;  %v400_v41 = vld [vmem:[%s647_s3 + $0x3] sm:$0x1] }
  0x2a   :  { %vm171_vm3 = vcmp.gt.f32.partialorder %v400_v41, 0.5  ;;  %v416_v41 = vld [vmem:[%s642_s1 + $0x6] sm:$0x1] }
  0x2b   :  { %390 = vst [vmem:[%s645_s5 + $0x1] sm:$0x1] %v82_v44  ;;  %431 = vrcp.f32 %v82_v44 }
  0x2c   :  { %433 = vrcp.f32 %v90_v45 }
  0x31   :  { %v432_v49 = vpop.eup %431 }
  0x32   :  { %v434_v50 = vpop.eup %433  ;;  %v86_v51 = vmul.f32 %v432_v49, %v80_v40  ;;  %v397_v40 = vld [vmem:[%s646_s0 + $0x3] sm:$0x1] }
  0x33   :  { %v92_v52 = vmul.f32 %v434_v50, %v87_v42  ;;  %v142_v42 = vmax.f32 %v397_v40, 1e-06 }
  0x35   :  { %v94_v56 = vsel %vm93_vm1, %v86_v51, %v92_v52  ;;  %v143_v49 = vmin.f32 %v142_v42, 0.999999  ;;  %v185_v52 = vmax.f32 %v404_v47, 1e-06  ;;  %v417_v42 = vld [vmem:[%s643_s2 + $0x6] sm:$0x1] }
  0x36   :  { %v95_v57 = vsub.f32 1.0, %v94_v56  ;;  %v267_v47 = vmax.f32 %v417_v42, 1e-06 }
  0x38   :  { %v96_v60 = vmul.f32 %v95_v57, %v65_v55  ;;  %v190_v57 = vmin.f32 %v189_v53, 0.999999 }
  0x3a   :  { %v97_v61 = vadd.f32 %v96_v60, %v94_v56  ;;  %v186_v56 = vmin.f32 %v185_v52, 0.999999  ;;  %v196_v60 = vsub.f32 1.0, %v190_v57 }
  0x3c   :  { %v98_v0 = vmax.f32 %v97_v61, 1e-06  ;;  %v205_v61 = vsub.f32 1.0, %v186_v56 }
  0x3e   :  { %v99_v1 = vmin.f32 %v98_v0, 0.999999 }
  0x40   :  { %395 = vst [vmem:[%s644_s6 + $0x2] sm:$0x1] %v99_v1  ;;  %v117_v4 = vsub.f32 1.0, %v99_v1  ;;  %v119_v5 = vmul.f32 %v118_v2, %v99_v1  ;;  %v126_v7 = vmul.f32 %v112_v63, %v99_v1 }
  0x42   :  { %v120_v6 = vmul.f32 %v117_v4, %v108_v62  ;;  %v128_v8 = vmul.f32 %v127_v3, %v117_v4 }
  0x44   :  { %v121_v9 = vadd.f32 %v120_v6, %v119_v5  ;;  %v129_v10 = vadd.f32 %v128_v8, %v126_v7  ;;  %v406_v6 = vld [vmem:[%s647_s3 + $0x4] sm:$0x1] }
  0x45   :  { %vm210_vm4 = vcmp.gt.f32.partialorder %v406_v6, 0.5  ;;  %v422_v6 = vld [vmem:[%s642_s1 + $0x7] sm:$0x1] }
  0x46   :  { %396 = vst [vmem:[%s645_s5 + $0x2] sm:$0x1] %v121_v9  ;;  %435 = vrcp.f32 %v121_v9 }
  0x47   :  { %437 = vrcp.f32 %v129_v10 }
  0x4c   :  { %v436_v14 = vpop.eup %435 }
  0x4d   :  { %v438_v15 = vpop.eup %437  ;;  %v125_v16 = vmul.f32 %v436_v14, %v119_v5  ;;  %v403_v5 = vld [vmem:[%s646_s0 + $0x4] sm:$0x1] }
  0x4e   :  { %v131_v17 = vmul.f32 %v438_v15, %v126_v7  ;;  %v181_v7 = vmax.f32 %v403_v5, 1e-06 }
  0x50   :  { %v133_v21 = vsel %vm132_vm2, %v125_v16, %v131_v17  ;;  %v182_v14 = vmin.f32 %v181_v7, 0.999999  ;;  %v224_v17 = vmax.f32 %v410_v12, 1e-06  ;;  %v423_v7 = vld [vmem:[%s643_s2 + $0x7] sm:$0x1] }
  0x51   :  { %v134_v22 = vsub.f32 1.0, %v133_v21  ;;  %v306_v12 = vmax.f32 %v423_v7, 1e-06 }
  0x53   :  { %v135_v25 = vmul.f32 %v134_v22, %v104_v20  ;;  %v229_v22 = vmin.f32 %v228_v18, 0.999999 }
  0x55   :  { %v136_v26 = vadd.f32 %v135_v25, %v133_v21  ;;  %v225_v21 = vmin.f32 %v224_v17, 0.999999  ;;  %v235_v25 = vsub.f32 1.0, %v229_v22 }
  0x57   :  { %v137_v29 = vmax.f32 %v136_v26, 1e-06  ;;  %v244_v26 = vsub.f32 1.0, %v225_v21 }
  0x59   :  { %v138_v30 = vmin.f32 %v137_v29, 0.999999 }
  0x5b   :  { %401 = vst [vmem:[%s644_s6 + $0x3] sm:$0x1] %v138_v30  ;;  %v156_v33 = vsub.f32 1.0, %v138_v30  ;;  %v158_v34 = vmul.f32 %v157_v31, %v138_v30  ;;  %v165_v36 = vmul.f32 %v151_v28, %v138_v30 }
  0x5d   :  { %v159_v35 = vmul.f32 %v156_v33, %v147_v27  ;;  %v167_v37 = vmul.f32 %v166_v32, %v156_v33 }
  0x5f   :  { %v160_v38 = vadd.f32 %v159_v35, %v158_v34  ;;  %v168_v39 = vadd.f32 %v167_v37, %v165_v36  ;;  %v412_v35 = vld [vmem:[%s647_s3 + $0x5] sm:$0x1] }
  0x60   :  { %vm249_vm5 = vcmp.gt.f32.partialorder %v412_v35, 0.5 }
  0x61   :  { %402 = vst [vmem:[%s645_s5 + $0x3] sm:$0x1] %v160_v38  ;;  %439 = vrcp.f32 %v160_v38 }
  0x62   :  { %441 = vrcp.f32 %v168_v39 }
  0x67   :  { %v440_v43 = vpop.eup %439 }
  0x68   :  { %v442_v44 = vpop.eup %441  ;;  %v164_v45 = vmul.f32 %v440_v43, %v158_v34  ;;  %v409_v34 = vld [vmem:[%s646_s0 + $0x5] sm:$0x1] }
  0x69   :  { %v170_v46 = vmul.f32 %v442_v44, %v165_v36  ;;  %v220_v36 = vmax.f32 %v409_v34, 1e-06 }
  0x6b   :  { %v172_v50 = vsel %vm171_vm3, %v164_v45, %v170_v46  ;;  %v221_v43 = vmin.f32 %v220_v36, 0.999999  ;;  %v263_v46 = vmax.f32 %v416_v41, 1e-06 }
  0x6c   :  { %v173_v51 = vsub.f32 1.0, %v172_v50 }
  0x6e   :  { %v174_v54 = vmul.f32 %v173_v51, %v143_v49  ;;  %v268_v51 = vmin.f32 %v267_v47, 0.999999 }
  0x70   :  { %v175_v55 = vadd.f32 %v174_v54, %v172_v50  ;;  %v264_v50 = vmin.f32 %v263_v46, 0.999999  ;;  %v274_v54 = vsub.f32 1.0, %v268_v51 }
  0x72   :  { %v176_v58 = vmax.f32 %v175_v55, 1e-06  ;;  %v283_v55 = vsub.f32 1.0, %v264_v50 }
  0x74   :  { %v177_v59 = vmin.f32 %v176_v58, 0.999999 }
  0x76   :  { %407 = vst [vmem:[%s644_s6 + $0x4] sm:$0x1] %v177_v59  ;;  %v195_v62 = vsub.f32 1.0, %v177_v59  ;;  %v197_v63 = vmul.f32 %v196_v60, %v177_v59  ;;  %v204_v1 = vmul.f32 %v190_v57, %v177_v59 }
  0x78   :  { %v198_v0 = vmul.f32 %v195_v62, %v186_v56  ;;  %v206_v2 = vmul.f32 %v205_v61, %v195_v62 }
  0x7a   :  { %v199_v3 = vadd.f32 %v198_v0, %v197_v63  ;;  %v207_v4 = vadd.f32 %v206_v2, %v204_v1  ;;  %v418_v0 = vld [vmem:[%s647_s3 + $0x6] sm:$0x1] }
  0x7b   :  { %vm288_vm6 = vcmp.gt.f32.partialorder %v418_v0, 0.5 }
  0x7c   :  { %408 = vst [vmem:[%s645_s5 + $0x4] sm:$0x1] %v199_v3  ;;  %443 = vrcp.f32 %v199_v3 }
  0x7d   :  { %445 = vrcp.f32 %v207_v4 }
  0x82   :  { %v444_v8 = vpop.eup %443 }
  0x83   :  { %v446_v9 = vpop.eup %445  ;;  %v203_v10 = vmul.f32 %v444_v8, %v197_v63  ;;  %v415_v63 = vld [vmem:[%s646_s0 + $0x6] sm:$0x1] }
  0x84   :  { %v209_v11 = vmul.f32 %v446_v9, %v204_v1  ;;  %v259_v1 = vmax.f32 %v415_v63, 1e-06 }
  0x86   :  { %v211_v15 = vsel %vm210_vm4, %v203_v10, %v209_v11  ;;  %v260_v8 = vmin.f32 %v259_v1, 0.999999  ;;  %v302_v11 = vmax.f32 %v422_v6, 1e-06 }
  0x87   :  { %v212_v16 = vsub.f32 1.0, %v211_v15 }
  0x89   :  { %v213_v19 = vmul.f32 %v212_v16, %v182_v14  ;;  %v307_v16 = vmin.f32 %v306_v12, 0.999999 }
  0x8b   :  { %v214_v20 = vadd.f32 %v213_v19, %v211_v15  ;;  %v303_v15 = vmin.f32 %v302_v11, 0.999999  ;;  %v313_v19 = vsub.f32 1.0, %v307_v16 }
  0x8d   :  { %v215_v23 = vmax.f32 %v214_v20, 1e-06  ;;  %v322_v20 = vsub.f32 1.0, %v303_v15 }
  0x8f   :  { %v216_v24 = vmin.f32 %v215_v23, 0.999999 }
  0x91   :  { %413 = vst [vmem:[%s644_s6 + $0x5] sm:$0x1] %v216_v24  ;;  %v234_v27 = vsub.f32 1.0, %v216_v24  ;;  %v236_v28 = vmul.f32 %v235_v25, %v216_v24  ;;  %v243_v30 = vmul.f32 %v229_v22, %v216_v24 }
  0x93   :  { %v237_v29 = vmul.f32 %v234_v27, %v225_v21  ;;  %v245_v31 = vmul.f32 %v244_v26, %v234_v27 }
  0x95   :  { %v238_v32 = vadd.f32 %v237_v29, %v236_v28  ;;  %v246_v33 = vadd.f32 %v245_v31, %v243_v30  ;;  %v424_v29 = vld [vmem:[%s647_s3 + $0x7] sm:$0x1] }
  0x96   :  { %vm327_vm7 = vcmp.gt.f32.partialorder %v424_v29, 0.5 }
  0x97   :  { %414 = vst [vmem:[%s645_s5 + $0x5] sm:$0x1] %v238_v32  ;;  %447 = vrcp.f32 %v238_v32 }
  0x98   :  { %449 = vrcp.f32 %v246_v33 }
  0x9d   :  { %v448_v37 = vpop.eup %447 }
  0x9e   :  { %v450_v38 = vpop.eup %449  ;;  %v242_v39 = vmul.f32 %v448_v37, %v236_v28  ;;  %v421_v28 = vld [vmem:[%s646_s0 + $0x7] sm:$0x1] }
  0x9f   :  { %v248_v40 = vmul.f32 %v450_v38, %v243_v30  ;;  %v298_v30 = vmax.f32 %v421_v28, 1e-06 }
  0xa1   :  { %v250_v44 = vsel %vm249_vm5, %v242_v39, %v248_v40  ;;  %v299_v35 = vmin.f32 %v298_v30, 0.999999 }
  0xa2   :  { %v251_v45 = vsub.f32 1.0, %v250_v44 }
  0xa4   :  { %v252_v48 = vmul.f32 %v251_v45, %v221_v43 }
  0xa6   :  { %v253_v49 = vadd.f32 %v252_v48, %v250_v44 }
  0xa8   :  { %v254_v52 = vmax.f32 %v253_v49, 1e-06 }
  0xaa   :  { %v255_v53 = vmin.f32 %v254_v52, 0.999999 }
  0xac   :  { %419 = vst [vmem:[%s644_s6 + $0x6] sm:$0x1] %v255_v53  ;;  %v273_v56 = vsub.f32 1.0, %v255_v53  ;;  %v275_v57 = vmul.f32 %v274_v54, %v255_v53  ;;  %v282_v59 = vmul.f32 %v268_v51, %v255_v53 }
  0xae   :  { %v276_v58 = vmul.f32 %v273_v56, %v264_v50  ;;  %v284_v60 = vmul.f32 %v283_v55, %v273_v56 }
  0xb0   :  { %v277_v61 = vadd.f32 %v276_v58, %v275_v57  ;;  %v285_v62 = vadd.f32 %v284_v60, %v282_v59 }
  0xb2   :  { %420 = vst [vmem:[%s645_s5 + $0x6] sm:$0x1] %v277_v61  ;;  %451 = vrcp.f32 %v277_v61 }
  0xb3   :  { %453 = vrcp.f32 %v285_v62 }
  0xb8   :  { %v452_v2 = vpop.eup %451 }
  0xb9   :  { %v454_v3 = vpop.eup %453  ;;  %v281_v4 = vmul.f32 %v452_v2, %v275_v57 }
  0xba   :  { %v287_v5 = vmul.f32 %v454_v3, %v282_v59 }
  0xbc   :  { %v289_v9 = vsel %vm288_vm6, %v281_v4, %v287_v5 }
  0xbd   :  { %v290_v10 = vsub.f32 1.0, %v289_v9 }
  0xbf   :  { %v291_v13 = vmul.f32 %v290_v10, %v260_v8 }
  0xc1   :  { %v292_v14 = vadd.f32 %v291_v13, %v289_v9 }
  0xc3   :  { %v293_v17 = vmax.f32 %v292_v14, 1e-06 }
  0xc5   :  { %v294_v18 = vmin.f32 %v293_v17, 0.999999 }
  0xc7   :  { %425 = vst [vmem:[%s644_s6 + $0x7] sm:$0x1] %v294_v18  ;;  %v312_v21 = vsub.f32 1.0, %v294_v18  ;;  %v314_v22 = vmul.f32 %v313_v19, %v294_v18  ;;  %v321_v24 = vmul.f32 %v307_v16, %v294_v18 }
  0xc9   :  { %v315_v23 = vmul.f32 %v312_v21, %v303_v15  ;;  %v323_v25 = vmul.f32 %v322_v20, %v312_v21 }
  0xcb   :  { %v316_v26 = vadd.f32 %v315_v23, %v314_v22  ;;  %v324_v27 = vadd.f32 %v323_v25, %v321_v24 }
  0xcd   :  { %426 = vst [vmem:[%s645_s5 + $0x7] sm:$0x1] %v316_v26  ;;  %455 = vrcp.f32 %v316_v26 }
  0xce   :  { %457 = vrcp.f32 %v324_v27 }
  0xd3   :  { %v456_v31 = vpop.eup %455 }
  0xd4   :  { %v458_v32 = vpop.eup %457  ;;  %v320_v33 = vmul.f32 %v456_v31, %v314_v22 }
  0xd5   :  { %v326_v34 = vmul.f32 %v458_v32, %v321_v24 }
  0xd7   :  { %v328_v36 = vsel %vm327_vm7, %v320_v33, %v326_v34 }
  0xd8   :  { %v329_v37 = vsub.f32 1.0, %v328_v36 }
  0xda   :  { %v330_v38 = vmul.f32 %v329_v37, %v299_v35 }
  0xdc   :  { %v331_v39 = vadd.f32 %v330_v38, %v328_v36 }
  0xde   :  { %v332_v40 = vmax.f32 %v331_v39, 1e-06 }
  0xe0   :  { %v333_v41 = vmin.f32 %v332_v40, 0.999999 }
  0xe2   :  { %334 = vst [vmem:[#allocation2] sm:$0x1] %v333_v41 }

</bundles_post_ra>
